<compile_context>
chip_gen: v6e
topology: v6e:2x2x1
jax: 0.10.0
libtpu: 0.0.40
codegen_flags: <defaults>
</compile_context>

<pallas_src>
import jax
import jax.numpy as jnp
import numpy as np
from jax import lax
from jax.experimental import pallas as pl
from jax.experimental.pallas import tpu as pltpu

# Small synthetic sizes consistent with the module's forward.
B = 8              # batch
D = 32             # flattened input features
E = 4              # num_experts
C = 10             # num_classes
EC = E * C         # packed expert-output lanes
L = E + EC         # fused logit lanes: [ gate(E) | expert0(C) | ... | expert_{E-1}(C) ]
NS = E + 1         # softmax segments: gate + one per expert
OUT_LANES = 128    # packed output slab width (unmasked vst)
# packed output lane layout: [ mixture(C) | gate probs(E) | expert outputs(EC) | zero pad ]

_PREC = lax.Precision.HIGHEST  # keep the tiny MXU dots effectively exact f32


def _build_constants():
    """Iota-derived one-hot constants, built once on host (not per grid step)."""
    seg_id = np.empty((L,), np.int32)
    seg_id[:E] = 0                         # gate lanes -> segment 0
    seg_id[E:] = 1 + np.arange(EC) // C    # expert e lanes -> segment 1 + e
    lanes = np.arange(L)

    seg_b = np.zeros((NS, L), np.float32)  # segment -> lanes broadcast (one-hot columns)
    seg_b[seg_id, lanes] = 1.0
    seg_r = np.ascontiguousarray(seg_b.T)  # lanes -> segment reduce

    # gate lane e -> every lane of expert e (zero elsewhere)
    g2e = np.zeros((L, L), np.float32)
    for e in range(E):
        g2e[e, E + e * C: E + (e + 1) * C] = 1.0

    # packed-output placement matrices (single lane-dense store)
    pack_mix = np.zeros((L, OUT_LANES), np.float32)  # expert lane (e, c) -> class lane c
    for e in range(E):
        pack_mix[E + e * C + np.arange(C), np.arange(C)] = 1.0
    pack_raw = np.zeros((L, OUT_LANES), np.float32)  # softmax lane i -> lane C + i
    pack_raw[lanes, C + lanes] = 1.0

    gate_mask = np.zeros((1, L), np.float32)         # 1 on gate lanes (temperature scale)
    gate_mask[0, :E] = 1.0
    return seg_b, seg_r, g2e, pack_mix, pack_raw, gate_mask


(_SEG_B, _SEG_R, _G2E, _PACK_MIX, _PACK_RAW, _GATE_MASK) = _build_constants()


def moe_kernel(x_ref, w_ref, b_ref, ts_ref, segb_ref, segr_ref, g2e_ref,
               pmix_ref, praw_ref, out_ref):
    """Lane-dense MoE forward on one batch tile.

    x_ref   : (TB, D)         inputs
    w_ref   : (D, L)          packed [gate | experts] weights (resident)
    b_ref   : (1, L)          packed biases
    ts_ref  : (1, L)          per-lane temperature scale (1/T on gate lanes, 1 elsewhere)
    segb_ref: (NS, L)         segment -> lane one-hot broadcast matrix
    segr_ref: (L, NS)         lane -> segment one-hot reduce matrix
    g2e_ref : (L, L)          gate-lane -> expert-lane broadcast matrix
    pmix_ref: (L, OUT_LANES)  fold gate-weighted expert lanes into class lanes [0, C)
    praw_ref: (L, OUT_LANES)  copy softmax lanes into lanes [C, C+L)
    out_ref : (TB, OUT_LANES) packed output slab (single unmasked store)
    """
    x = x_ref[...]

    # One fused MXU dot for gate + all experts; bias; gate temperature scale.
    z = jnp.dot(x, w_ref[...], precision=_PREC,
                preferred_element_type=jnp.float32)
    z = (z + b_ref[...]) * ts_ref[...]                                   # (TB, L)

    segb = segb_ref[...]                                                 # (NS, L)

    # Per-segment max — the only 3-D intermediate, used for the max alone.
    zm = jnp.where(segb[None, :, :] > 0.0, z[:, None, :], -jnp.inf)      # (TB, NS, L)
    m_seg = jnp.max(zm, axis=-1)                                         # (TB, NS)

    # Broadcast max back to lanes with a one-hot MXU dot, exp on the 2-D slab,
    # segment sums via a one-hot MXU dot, reciprocal-multiply normalize.
    m_lanes = jnp.dot(m_seg, segb, precision=_PREC,
                      preferred_element_type=jnp.float32)                # (TB, L)
    pe = jnp.exp(z - m_lanes)                                            # (TB, L)
    s = jnp.dot(pe, segr_ref[...], precision=_PREC,
                preferred_element_type=jnp.float32)                      # (TB, NS)
    inv_lanes = jnp.dot(1.0 / s, segb, precision=_PREC,
                        preferred_element_type=jnp.float32)              # (TB, L)
    smax = pe * inv_lanes        # lanes [0,E): gate probs p; lanes [E,L): expert softmax y

    # Mixture without 3-D broadcasts: gate probs to expert lanes via one-hot
    # MXU dot, elementwise multiply, class fold via another one-hot dot.
    g_lanes = jnp.dot(smax, g2e_ref[...], precision=_PREC,
                      preferred_element_type=jnp.float32)                # (TB, L)
    wy = smax * g_lanes                                                  # gate lanes -> 0

    # Single lane-dense packed store: [mixture | gate probs | expert outputs | pad].
    out_ref[...] = (
        jnp.dot(wy, pmix_ref[...], precision=_PREC,
                preferred_element_type=jnp.float32)
        + jnp.dot(smax, praw_ref[...], precision=_PREC,
                  preferred_element_type=jnp.float32))


def moe_forward(x, expert_w, expert_b, gate_w, gate_b, T=1.0, *, tb=None):
    """Returns (output (B,C), gate_outputs (B,E), expert_outputs (B,E,C)),
    matching the torch forward: output = sum_e gate[:, e] * expert_e(x)."""
    bsz = x.shape[0]
    if tb is None:
        tb = bsz if bsz <= 256 else 256   # batch tile (grid step)
    assert bsz % tb == 0, "batch must divide the batch tile"
    nb = bsz // tb

    # Lane-packed weight slab [gate | expert0 | ...] and packed biases (once per call).
    w_all = jnp.concatenate(
        [gate_w, jnp.transpose(expert_w, (1, 0, 2)).reshape(D, EC)], axis=1)   # (D, L)
    b_all = jnp.concatenate([gate_b, expert_b.reshape(1, EC)], axis=1)         # (1, L)
    # Per-lane temperature scale: 1/T on the gate lanes, 1 on expert lanes.
    tscale = jnp.asarray(_GATE_MASK) * (1.0 / T - 1.0) + 1.0                   # (1, L)
    # NOTE(v6e/v7x at scale): cast x / w_all to bfloat16 here for the fused MXU
    # dot (keep preferred_element_type=f32); kept f32 for the 1e-5 check.

    resident = lambda shape: pl.BlockSpec(shape, lambda i: (0, 0))

    packed = pl.pallas_call(
        moe_kernel,
        out_shape=jax.ShapeDtypeStruct((bsz, OUT_LANES), jnp.float32),
        grid=(nb,),
        in_specs=[
            pl.BlockSpec((tb, D), lambda i: (i, 0)),   # x: batch-tiled, pipelined
            resident((D, L)),                          # w_all
            resident((1, L)),                          # b_all
            resident((1, L)),                          # tscale
            resident((NS, L)),                         # seg_b
            resident((L, NS)),                         # seg_r
            resident((L, L)),                          # g2e
            resident((L, OUT_LANES)),                  # pack_mix
            resident((L, OUT_LANES)),                  # pack_raw
        ],
        out_specs=pl.BlockSpec((tb, OUT_LANES), lambda i: (i, 0)),
        compiler_params=pltpu.CompilerParams(
            dimension_semantics=("parallel",)),        # v7x: shard grid across both TCs
    )(x, w_all, b_all, tscale,
      jnp.asarray(_SEG_B), jnp.asarray(_SEG_R), jnp.asarray(_G2E),
      jnp.asarray(_PACK_MIX), jnp.asarray(_PACK_RAW))

    # Slice the packed slab apart (free XLA ops outside the kernel).
    out = packed[:, :C]                                   # mixture output (B, C)
    p = packed[:, C:C + E]                                # gate_outputs   (B, E)
    y = packed[:, C + E:C + E + EC].reshape(bsz, E, C)    # expert_outputs (B, E, C)
    return out, p, y


def moe_forward_ref(x, expert_w, expert_b, gate_w, gate_b, T=1.0):
    prec = lax.Precision.HIGHEST
    g = jax.nn.softmax((jnp.dot(x, gate_w, precision=prec) + gate_b) / T, axis=-1)  # (B, E)
    logits = jnp.einsum('bd,edc->bec', x, expert_w,
                        precision=prec) + expert_b[:, 0, :][None]
    y = jax.nn.softmax(logits, axis=-1)                                             # (B, E, C)
    out = jnp.sum(g[:, :, None] * y, axis=1)                                        # (B, C)
    return out, g, y


if __name__ == "__main__":
    key = jax.random.PRNGKey(0)
    kx, kew, keb, kgw, kgb = jax.random.split(key, 5)

    x = jax.random.normal(kx, (B, D), jnp.float32)
    expert_w = 0.1 * jax.random.normal(kew, (E, D, C), jnp.float32)
    expert_b = 0.1 * jax.random.normal(keb, (E, 1, C), jnp.float32)
    gate_w = 0.1 * jax.random.normal(kgw, (D, E), jnp.float32)
    gate_b = 0.1 * jax.random.normal(kgb, (1, E), jnp.float32)

    T = 1.5  # exercise the gate-temperature path
    fwd = jax.jit(moe_forward, static_argnames=("tb",))
    out, gate_outputs, expert_outputs = jax.block_until_ready(
        fwd(x, expert_w, expert_b, gate_w, gate_b, T))

    out_r, g_r, y_r = moe_forward_ref(x, expert_w, expert_b, gate_w, gate_b, T)
    np.testing.assert_allclose(np.asarray(out), np.asarray(out_r), rtol=1e-5, atol=1e-5)
    np.testing.assert_allclose(np.asarray(gate_outputs), np.asarray(g_r), rtol=1e-5, atol=1e-5)
    np.testing.assert_allclose(np.asarray(expert_outputs), np.asarray(y_r), rtol=1e-5, atol=1e-5)

    print("KERNEL_OK")
</pallas_src>

<mosaic_0001>
module attributes {stable_mosaic.version = 11 : i64} {
  func.func @moe_kernel(%arg0: i32, %arg1: memref<8x32xf32, #tpu.memory_space<vmem>>, %arg2: memref<32x44xf32, #tpu.memory_space<vmem>>, %arg3: memref<1x44xf32, #tpu.memory_space<vmem>>, %arg4: memref<1x44xf32, #tpu.memory_space<vmem>>, %arg5: memref<5x44xf32, #tpu.memory_space<vmem>>, %arg6: memref<44x5xf32, #tpu.memory_space<vmem>>, %arg7: memref<44x44xf32, #tpu.memory_space<vmem>>, %arg8: memref<44x128xf32, #tpu.memory_space<vmem>>, %arg9: memref<44x128xf32, #tpu.memory_space<vmem>>, %arg10: memref<8x128xf32, #tpu.memory_space<vmem>>) attributes {dimension_semantics = [#tpu.dimension_semantics<parallel>], iteration_bounds = array<i64: 1>, scalar_prefetch = 0 : i64, scratch_operands = 0 : i64, tpu.core_type = #tpu.core_type<tc>, window_params = [{transform_indices = @transform_0, window_bounds = array<i64: 8, 32>}, {pipeline_mode = #tpu.pipeline_mode<synchronous>, transform_indices = @transform_1, window_bounds = array<i64: 32, 44>}, {pipeline_mode = #tpu.pipeline_mode<synchronous>, transform_indices = @transform_2, window_bounds = array<i64: 1, 44>}, {pipeline_mode = #tpu.pipeline_mode<synchronous>, transform_indices = @transform_3, window_bounds = array<i64: 1, 44>}, {pipeline_mode = #tpu.pipeline_mode<synchronous>, transform_indices = @transform_4, window_bounds = array<i64: 5, 44>}, {pipeline_mode = #tpu.pipeline_mode<synchronous>, transform_indices = @transform_5, window_bounds = array<i64: 44, 5>}, {pipeline_mode = #tpu.pipeline_mode<synchronous>, transform_indices = @transform_6, window_bounds = array<i64: 44, 44>}, {pipeline_mode = #tpu.pipeline_mode<synchronous>, transform_indices = @transform_7, window_bounds = array<i64: 44, 128>}, {pipeline_mode = #tpu.pipeline_mode<synchronous>, transform_indices = @transform_8, window_bounds = array<i64: 44, 128>}, {transform_indices = @transform_9, window_bounds = array<i64: 8, 128>}]} {
    %c0 = arith.constant 0 : index
    %c0_0 = arith.constant 0 : index
    %0 = vector.load %arg1[%c0, %c0_0] : memref<8x32xf32, #tpu.memory_space<vmem>>, vector<8x32xf32>
    %c0_1 = arith.constant 0 : index
    %c0_2 = arith.constant 0 : index
    %1 = vector.load %arg2[%c0_1, %c0_2] : memref<32x44xf32, #tpu.memory_space<vmem>>, vector<32x44xf32>
    %cst = arith.constant dense<0.000000e+00> : vector<8x44xf32>
    %2 = tpu.matmul %0, %1, %cst {dimension_numbers = #tpu.dot_dimension_numbers<[1], [0], [0], [1], [0, 0, 1, 1], [], []>, precision = #tpu.contract_precision<fp32>} : vector<8x32xf32>, vector<32x44xf32>, vector<8x44xf32> -> vector<8x44xf32>
    %c0_3 = arith.constant 0 : index
    %c0_4 = arith.constant 0 : index
    %3 = vector.load %arg3[%c0_3, %c0_4] : memref<1x44xf32, #tpu.memory_space<vmem>>, vector<1x44xf32>
    %4 = vector.broadcast %3 : vector<1x44xf32> to vector<8x44xf32>
    %5 = arith.addf %2, %4 : vector<8x44xf32>
    %c0_5 = arith.constant 0 : index
    %c0_6 = arith.constant 0 : index
    %6 = vector.load %arg4[%c0_5, %c0_6] : memref<1x44xf32, #tpu.memory_space<vmem>>, vector<1x44xf32>
    %7 = vector.broadcast %6 : vector<1x44xf32> to vector<8x44xf32>
    %8 = arith.mulf %5, %7 : vector<8x44xf32>
    %c0_7 = arith.constant 0 : index
    %c0_8 = arith.constant 0 : index
    %9 = vector.load %arg5[%c0_7, %c0_8] : memref<5x44xf32, #tpu.memory_space<vmem>>, vector<5x44xf32>
    %10 = vector.shape_cast %9 : vector<5x44xf32> to vector<1x5x44xf32>
    %cst_9 = arith.constant 0.000000e+00 : f32
    %11 = vector.broadcast %cst_9 : f32 to vector<1x5x44xf32>
    %12 = arith.cmpf ogt, %10, %11 : vector<1x5x44xf32>
    %13 = vector.shape_cast %8 : vector<8x44xf32> to vector<8x1x44xf32>
    %cst_10 = arith.constant 0xFF800000 : f32
    %14 = vector.shape_cast %12 : vector<1x5x44xi1> to vector<1x5x44xi1>
    %15 = vector.broadcast %14 : vector<1x5x44xi1> to vector<8x5x44xi1>
    %16 = vector.shape_cast %13 : vector<8x1x44xf32> to vector<8x1x44xf32>
    %17 = vector.broadcast %16 : vector<8x1x44xf32> to vector<8x5x44xf32>
    %18 = vector.broadcast %cst_10 : f32 to vector<8x5x44xf32>
    %19 = arith.select %15, %17, %18 : vector<8x5x44xi1>, vector<8x5x44xf32>
    %cst_11 = arith.constant dense<0xFF800000> : vector<8x5xf32>
    %20 = vector.multi_reduction <maximumf>, %19, %cst_11 [2] : vector<8x5x44xf32> to vector<8x5xf32>
    %cst_12 = arith.constant dense<0.000000e+00> : vector<8x44xf32>
    %21 = tpu.matmul %20, %9, %cst_12 {dimension_numbers = #tpu.dot_dimension_numbers<[1], [0], [0], [1], [0, 0, 1, 1], [], []>, precision = #tpu.contract_precision<fp32>} : vector<8x5xf32>, vector<5x44xf32>, vector<8x44xf32> -> vector<8x44xf32>
    %22 = arith.subf %8, %21 : vector<8x44xf32>
    %23 = math.exp %22 : vector<8x44xf32>
    %c0_13 = arith.constant 0 : index
    %c0_14 = arith.constant 0 : index
    %24 = vector.load %arg6[%c0_13, %c0_14] : memref<44x5xf32, #tpu.memory_space<vmem>>, vector<44x5xf32>
    %cst_15 = arith.constant dense<0.000000e+00> : vector<8x5xf32>
    %25 = tpu.matmul %23, %24, %cst_15 {dimension_numbers = #tpu.dot_dimension_numbers<[1], [0], [0], [1], [0, 0, 1, 1], [], []>, precision = #tpu.contract_precision<fp32>} : vector<8x44xf32>, vector<44x5xf32>, vector<8x5xf32> -> vector<8x5xf32>
    %cst_16 = arith.constant 1.000000e+00 : f32
    %26 = vector.broadcast %cst_16 : f32 to vector<8x5xf32>
    %27 = arith.divf %26, %25 : vector<8x5xf32>
    %cst_17 = arith.constant dense<0.000000e+00> : vector<8x44xf32>
    %28 = tpu.matmul %27, %9, %cst_17 {dimension_numbers = #tpu.dot_dimension_numbers<[1], [0], [0], [1], [0, 0, 1, 1], [], []>, precision = #tpu.contract_precision<fp32>} : vector<8x5xf32>, vector<5x44xf32>, vector<8x44xf32> -> vector<8x44xf32>
    %29 = arith.mulf %23, %28 : vector<8x44xf32>
    %c0_18 = arith.constant 0 : index
    %c0_19 = arith.constant 0 : index
    %30 = vector.load %arg7[%c0_18, %c0_19] : memref<44x44xf32, #tpu.memory_space<vmem>>, vector<44x44xf32>
    %cst_20 = arith.constant dense<0.000000e+00> : vector<8x44xf32>
    %31 = tpu.matmul %29, %30, %cst_20 {dimension_numbers = #tpu.dot_dimension_numbers<[1], [0], [0], [1], [0, 0, 1, 1], [], []>, precision = #tpu.contract_precision<fp32>} : vector<8x44xf32>, vector<44x44xf32>, vector<8x44xf32> -> vector<8x44xf32>
    %32 = arith.mulf %29, %31 : vector<8x44xf32>
    %c0_21 = arith.constant 0 : index
    %c0_22 = arith.constant 0 : index
    %33 = vector.load %arg8[%c0_21, %c0_22] : memref<44x128xf32, #tpu.memory_space<vmem>>, vector<44x128xf32>
    %cst_23 = arith.constant dense<0.000000e+00> : vector<8x128xf32>
    %34 = tpu.matmul %32, %33, %cst_23 {dimension_numbers = #tpu.dot_dimension_numbers<[1], [0], [0], [1], [0, 0, 1, 1], [], []>, precision = #tpu.contract_precision<fp32>} : vector<8x44xf32>, vector<44x128xf32>, vector<8x128xf32> -> vector<8x128xf32>
    %c0_24 = arith.constant 0 : index
    %c0_25 = arith.constant 0 : index
    %35 = vector.load %arg9[%c0_24, %c0_25] : memref<44x128xf32, #tpu.memory_space<vmem>>, vector<44x128xf32>
    %cst_26 = arith.constant dense<0.000000e+00> : vector<8x128xf32>
    %36 = tpu.matmul %29, %35, %cst_26 {dimension_numbers = #tpu.dot_dimension_numbers<[1], [0], [0], [1], [0, 0, 1, 1], [], []>, precision = #tpu.contract_precision<fp32>} : vector<8x44xf32>, vector<44x128xf32>, vector<8x128xf32> -> vector<8x128xf32>
    %37 = arith.addf %34, %36 : vector<8x128xf32>
    %c0_27 = arith.constant 0 : index
    %c0_28 = arith.constant 0 : index
    %38 = vector.load %arg10[%c0_27, %c0_28] : memref<8x128xf32, #tpu.memory_space<vmem>>, vector<8x128xf32>
    tpu.vector_store %arg10[%c0_27, %c0_28], %37 {strides = array<i32>} : memref<8x128xf32, #tpu.memory_space<vmem>>, vector<8x128xf32>,
    return
  }
  func.func @transform_0(%arg0: i32) -> (i32, i32) {
    %c0_i32 = arith.constant 0 : i32
    %c0_i32_0 = arith.constant 0 : i32
    return %arg0, %c0_i32 : i32, i32
  }
  func.func @transform_1(%arg0: i32) -> (i32, i32) {
    %c0_i32 = arith.constant 0 : i32
    %c0_i32_0 = arith.constant 0 : i32
    %c0_i32_1 = arith.constant 0 : i32
    return %c0_i32, %c0_i32_0 : i32, i32
  }
  func.func @transform_2(%arg0: i32) -> (i32, i32) {
    %c0_i32 = arith.constant 0 : i32
    %c0_i32_0 = arith.constant 0 : i32
    %c0_i32_1 = arith.constant 0 : i32
    return %c0_i32, %c0_i32_0 : i32, i32
  }
  func.func @transform_3(%arg0: i32) -> (i32, i32) {
    %c0_i32 = arith.constant 0 : i32
    %c0_i32_0 = arith.constant 0 : i32
    %c0_i32_1 = arith.constant 0 : i32
    return %c0_i32, %c0_i32_0 : i32, i32
  }
  func.func @transform_4(%arg0: i32) -> (i32, i32) {
    %c0_i32 = arith.constant 0 : i32
    %c0_i32_0 = arith.constant 0 : i32
    %c0_i32_1 = arith.constant 0 : i32
    return %c0_i32, %c0_i32_0 : i32, i32
  }
  func.func @transform_5(%arg0: i32) -> (i32, i32) {
    %c0_i32 = arith.constant 0 : i32
    %c0_i32_0 = arith.constant 0 : i32
    %c0_i32_1 = arith.constant 0 : i32
    return %c0_i32, %c0_i32_0 : i32, i32
  }
  func.func @transform_6(%arg0: i32) -> (i32, i32) {
    %c0_i32 = arith.constant 0 : i32
    %c0_i32_0 = arith.constant 0 : i32
    %c0_i32_1 = arith.constant 0 : i32
    return %c0_i32, %c0_i32_0 : i32, i32
  }
  func.func @transform_7(%arg0: i32) -> (i32, i32) {
    %c0_i32 = arith.constant 0 : i32
    %c0_i32_0 = arith.constant 0 : i32
    %c0_i32_1 = arith.constant 0 : i32
    return %c0_i32, %c0_i32_0 : i32, i32
  }
  func.func @transform_8(%arg0: i32) -> (i32, i32) {
    %c0_i32 = arith.constant 0 : i32
    %c0_i32_0 = arith.constant 0 : i32
    %c0_i32_1 = arith.constant 0 : i32
    return %c0_i32, %c0_i32_0 : i32, i32
  }
  func.func @transform_9(%arg0: i32) -> (i32, i32) {
    %c0_i32 = arith.constant 0 : i32
    %c0_i32_0 = arith.constant 0 : i32
    return %arg0, %c0_i32 : i32, i32
  }
}

</mosaic_0001>

<bundles_post_ra>
// kernel: moe_forward.1
= control target key start
LH: loop header
LB: loop body
LE: loop exit
PB: predicated region body
PF: predicated region fallthrough
CT: control target
= control target key end

     0   :  { %vm44_vm0 = vcmask 261120   ;;  %v4446_v0 = vmov 0.0   ;;  %vm4447_vm1 = vmmov 0   ;;  %v548_v32 = vlaneseq  ;;  %s5362_s1 = inlined_call_operand.vmem [shape: f32[32,44], index: 1, kind: input, shape index: {}]   ;;  %s5363_s0 = inlined_call_operand.vmem [shape: f32[8,32], index: 0, kind: input, shape index: {}]   ;;  %s5364_s2 = inlined_call_operand.vmem [shape: f32[1,44], index: 2, kind: input, shape index: {}]   ;;  %s5365_s3 = inlined_call_operand.vmem [shape: f32[1,44], index: 3, kind: input, shape index: {}]   ;;  %s5366_s4 = inlined_call_operand.vmem [shape: f32[5,44], index: 4, kind: input, shape index: {}]   ;;  %s5367_s5 = inlined_call_operand.vmem [shape: f32[44,5], index: 5, kind: input, shape index: {}]   ;;  %s5368_s6 = inlined_call_operand.vmem [shape: f32[44,44], index: 6, kind: input, shape index: {}]   ;;  %s5369_s8 = inlined_call_operand.vmem [shape: f32[44,128], index: 8, kind: input, shape index: {}]   ;;  %s5370_s7 = inlined_call_operand.vmem [shape: f32[44,128], index: 7, kind: input, shape index: {}]   ;;  %s5371_s9 = inlined_call_operand.vmem [shape: f32[8,128], index: 9, kind: output, shape index: {}]  }
   0x1   :  { %3953 = vmatprep.subr.mxu0 %v4446_v0  ;;  %v36_v1 = vld [vmem:[%s5362_s1 + $0x18] sm:$0xff]  ;;  %v35_v2 = vld [vmem:[%s5362_s1 + $0x10] sm:$0xff]  ;;  %v34_v3 = vld [vmem:[%s5362_s1 + $0x8] sm:$0xff]  ;;  %3964 = vmatprep.subr.mxu1 %v4446_v0  ;;  %v4448_v49 = vmov 1966171168   ;;  %vm643_vm3 = vcmask 356352  }
   0x2   :  { %v4510_v4 = vand.u32 4294901760, %v36_v1  ;;  %v4512_v5 = vand.u32 4294901760, %v35_v2  ;;  %v4514_v6 = vand.u32 4294901760, %v34_v3  ;;  %v33_v7 = vld [vmem:[%s5362_s1] sm:$0xff]  ;;  %3961 = vmatprep.mubr.msk.f32.mxu0 %vm4447_vm1, %v4446_v0  ;;  %3972 = vmatprep.mubr.msk.f32.mxu1 %vm4447_vm1, %v4446_v0  ;;  %v549_v33 = vshrl.u32 %v548_v32, 7 }
   0x3   :  { %v32_v8 = vld [vmem:[%s5363_s0] sm:$0xff]  ;;  %v4526_v9 = vand.u32 4294901760, %v33_v7  ;;  %v677_v34 = vand.u32 127, %v548_v32  ;;  %v546_v50 = vunpack.c.l.s4 %v4448_v49  ;;  %vm727_vm4 = vcmask 1044480  }
   0x4   :  { %v46_v10 = vsel %vm44_vm0, %v32_v8, 0  ;;  %3954 = vmatpush3.msra.mxu0 %v4510_v4  ;;  %v153_v11 = vsub.f32 %v36_v1, %v4510_v4  ;;  %v160_v13 = vsub.f32 %v35_v2, %v4512_v5  ;;  %v167_v14 = vsub.f32 %v34_v3, %v4514_v6  ;;  %v3729_v39 = vld [vmem:[%s5364_s2] ss:$0 sm:$0xff] }
   0x5   :  { %v4531_v12 = vand.u32 4294901760, %v46_v10  ;;  %3955 = vmatprep.subr.mxu0 %v4446_v0  ;;  %v174_v15 = vsub.f32 %v33_v7, %v4526_v9  ;;  %v4587_v35 = vsub.s32 %v677_v34, %v549_v33  ;;  %v547_v53 = vunpack.c.0.s8 %v546_v50  ;;  %v3730_v56 = vld [vmem:[%s5365_s3] ss:$0 sm:$0xff] }
   0x6   :  { %3956 = vmatpush3.msra.mxu0 %v4512_v5  ;;  %v154_v16 = vand.u32 4294901760, %v153_v11  ;;  %v161_v18 = vand.u32 4294901760, %v160_v13  ;;  %v168_v19 = vand.u32 4294901760, %v167_v14  ;;  %v541_v62 = vld [vmem:[%s5366_s4] sm:$0x1f]  ;;  %v597_v1 = vsub.s32 0, %v549_v33 }
   0x7   :  { %v118_v17 = vsub.f32 %v46_v10, %v4531_v12  ;;  %3957 = vmatprep.subr.mxu0 %v4446_v0  ;;  %v175_v20 = vand.u32 4294901760, %v174_v15  ;;  %v550_v58 = vsub.s32 %v547_v53, %v549_v33  ;;  %vm542_vm2 = vcmp.gt.f32.partialorder %v541_v62, 0.0 }
   0x8   :  { %3958 = vmatpush3.msra.mxu0 %v4514_v6  ;;  %v155_v21 = vsub.f32 %v153_v11, %v154_v16  ;;  %v162_v23 = vsub.f32 %v160_v13, %v161_v18  ;;  %v169_v24 = vsub.f32 %v167_v14, %v168_v19  ;;  %vm710_vm5 = vcmask 1041409  }
   0x9   :  { %v119_v22 = vand.u32 4294901760, %v118_v17  ;;  %3959 = vmatprep.subr.mxu0 %v4446_v0  ;;  %v176_v28 = vsub.f32 %v174_v15, %v175_v20  ;;  %vm712_vm6 = vcmask 1042434   ;;  %vm714_vm7 = vcmask 1043459  }
   0xa   :  { %3960 = vmatpush3.msra.mxu0 %v4526_v9  ;;  %v156_v25 = vand.u32 4294901760, %v155_v21  ;;  %v163_v27 = vand.u32 4294901760, %v162_v23  ;;  %v170_v30 = vand.u32 4294901760, %v169_v24  ;;  %vm716_vm8 = vcmask 1044484  }
   0xb   :  { %v120_v26 = vsub.f32 %v118_v17, %v119_v22  ;;  %3975 = vmatprep.subr.mxu0 %v4446_v0  ;;  %v177_v31 = vand.u32 4294901760, %v176_v28  ;;  %vm718_vm9 = vcmask 1045509   ;;  %vm720_vm10 = vcmask 1046534  }
   0xc   :  { %3965 = vmatpush3.msra.mxu1 %v156_v25  ;;  %vm722_vm11 = vcmask 1047559   ;;  %vm724_vm12 = vcmask 39936   ;;  %vm1190_vm13 = vcmask 1043456   ;;  %vm1186_vm14 = vcmask 359424  }
   0xd   :  { %v121_v29 = vand.u32 4294901760, %v120_v26  ;;  %3966 = vmatprep.subr.mxu1 %v4446_v0 }
   0xe   :  { %3967 = vmatpush3.msra.mxu1 %v163_v27 }
   0xf   :  { %3962 = vmatmul.mubr.f32.vlgmr.msra.gmra.mxu0 %v121_v29  ;;  %3968 = vmatprep.subr.mxu1 %v4446_v0 }
  0x10   :  { %3976 = vmatpush3.msra.mxu0 %v153_v11  ;;  %3969 = vmatpush3.msra.mxu1 %v170_v30 }
  0x11   :  { %3977 = vmatprep.subr.mxu0 %v4446_v0  ;;  %3970 = vmatprep.subr.mxu1 %v4446_v0 }
  0x12   :  { %3978 = vmatpush3.msra.mxu0 %v160_v13  ;;  %3971 = vmatpush3.msra.mxu1 %v177_v31 }
  0x13   :  { %3979 = vmatprep.subr.mxu0 %v4446_v0  ;;  %3973 = vmatmul.mubr.f32.vlgmr.msra.gmra.mxu1 %v4531_v12 }
  0x14   :  { %3980 = vmatpush3.msra.mxu0 %v167_v14  ;;  %3986 = vmatprep.subr.mxu1 %v4446_v0 }
  0x15   :  { %3981 = vmatprep.subr.mxu0 %v4446_v0  ;;  %3987 = vmatpush3.msra.mxu1 %v4510_v4 }
  0x16   :  { %3982 = vmatpush3.msra.mxu0 %v174_v15  ;;  %3983 = vmatprep.mubr.msk.f32.mxu0 %vm4447_vm1, %v4446_v0 }
  0x17   :  { %3988 = vmatprep.subr.mxu1 %v4446_v0  ;;  %3997 = vmatprep.subr.mxu0 %v4446_v0 }
  0x18   :  { %3984 = vmatmul.mubr.f32.vlgmr.msra.gmra.mxu0 %v118_v17  ;;  %3989 = vmatpush3.msra.mxu1 %v4512_v5 }
  0x19   :  { %3998 = vmatpush3.msra.mxu0 %v154_v16  ;;  %3990 = vmatprep.subr.mxu1 %v4446_v0 }
  0x1a   :  { %3999 = vmatprep.subr.mxu0 %v4446_v0  ;;  %3991 = vmatpush3.msra.mxu1 %v4514_v6 }
  0x1b   :  { %4000 = vmatpush3.msra.mxu0 %v161_v18  ;;  %3992 = vmatprep.subr.mxu1 %v4446_v0 }
  0x1c   :  { %4001 = vmatprep.subr.mxu0 %v4446_v0  ;;  %3993 = vmatpush3.msra.mxu1 %v4526_v9 }
  0x1d   :  { %3994 = vmatprep.mubr.msk.f32.mxu1 %vm4447_vm1, %v4446_v0  ;;  %4002 = vmatpush3.msra.mxu0 %v168_v19 }
  0x1e   :  { %3995 = vmatmul.mubr.f32.vlgmr.msra.gmra.mxu1 %v119_v22  ;;  %4003 = vmatprep.subr.mxu0 %v4446_v0 }
  0x1f   :  { %4008 = vmatprep.subr.mxu1 %v4446_v0  ;;  %4004 = vmatpush3.msra.mxu0 %v175_v20 }
  0x20   :  { %4005 = vmatprep.mubr.msk.f32.mxu0 %vm4447_vm1, %v4446_v0  ;;  %4009 = vmatpush3.msra.mxu1 %v4510_v4 }
  0x21   :  { %4006 = vmatmul.mubr.f32.vlgmr.msra.gmra.mxu0 %v4531_v12  ;;  %4010 = vmatprep.subr.mxu1 %v4446_v0 }
  0x22   :  { %4016 = vmatprep.mubr.msk.f32.mxu1 %vm4447_vm1, %v4446_v0  ;;  %4011 = vmatpush3.msra.mxu1 %v4512_v5 }
  0x23   :  { %4019 = vmatprep.subr.mxu0 %v4446_v0  ;;  %4012 = vmatprep.subr.mxu1 %v4446_v0 }
  0x24   :  { %4021 = vmatprep.mubr.msk.f32.mxu0 %vm4447_vm1, %v4446_v0  ;;  %4013 = vmatpush3.msra.mxu1 %v4514_v6 }
  0x25   :  { %4014 = vmatprep.subr.mxu1 %v4446_v0 }
  0x26   :  { %4015 = vmatpush3.msra.mxu1 %v4526_v9 }
  0x27   :  { %4017 = vmatmul.mubr.f32.vlgmr.msra.gmra.mxu1 %v4531_v12  ;;  %4024 = vmatprep.subr.mxu1 %v4446_v0 }
  0x28   :  { %4026 = vmatprep.mubr.msk.f32.mxu1 %vm4447_vm1, %v4446_v0 }
  0xcf   :  { %v123_v36 = vpop.f32.mrf.mxu0 }
  0xd0   :  { %v124_v42 = vadd.f32 %v3729_v39, %v123_v36 }
  0xd1   :  { %v3963_v37 = vpop.f32.mrf.mxu0 }
  0xd3   :  { %v214_v38 = vpop.f32.mrf.mxu1 }
  0xd4   :  { %v215_v44 = vadd.f32 %v214_v38, %v124_v42  ;;  %v729_v38 = vsel %vm727_vm4, %v541_v62, 0 }
  0xd5   :  { %v3974_v40 = vpop.f32.mrf.mxu1  ;;  %v4619_v39 = vand.u32 4294901760, %v729_v38 }
  0xd7   :  { %v4622_v40 = vsub.f32 %v729_v38, %v4619_v39  ;;  %4020 = vmatpush3.msra.mxu0 %v4619_v39 }
  0xd8   :  { %v294_v41 = vpop.f32.mrf.mxu0  ;;  %4029 = vmatprep.subr.mxu0 %v4446_v0 }
  0xd9   :  { %v295_v47 = vadd.f32 %v294_v41, %v215_v44  ;;  %v4627_v41 = vand.u32 4294901760, %v4622_v40 }
  0xda   :  { %v3985_v43 = vpop.f32.mrf.mxu0 }
  0xdb   :  { %v841_v42 = vsub.f32 %v4622_v40, %v4627_v41 }
  0xdd   :  { %v4631_v43 = vand.u32 4294901760, %v841_v42 }
  0xde   :  { %v371_v45 = vpop.f32.mrf.mxu1 }
  0xdf   :  { %v372_v51 = vadd.f32 %v371_v45, %v295_v47  ;;  %4025 = vmatpush3.msra.mxu1 %v4631_v43 }
  0xe0   :  { %v3996_v46 = vpop.f32.mrf.mxu1  ;;  %4034 = vmatprep.subr.mxu1 %v4446_v0 }
  0xe1   :  { %v454_v48 = vpop.f32.mrf.mxu0 }
  0xe2   :  { %v455_v54 = vadd.f32 %v454_v48, %v372_v51 }
  0xe3   :  { %v4007_v52 = vpop.f32.mrf.mxu0 }
  0xe7   :  { %v529_v55 = vpop.f32.mrf.mxu1 }
  0xe8   :  { %v530_v57 = vadd.f32 %v529_v55, %v455_v54 }
  0xe9   :  { %v4018_v59 = vpop.f32.mrf.mxu1 }
  0xea   :  { %v4595_v60 = vmul.f32 %v3730_v56, %v530_v57 }
  0xec   :  { %v544_v61 = vcombine.high %v4595_v60, %v4595_v60  ;;  %v551_v63 = vrot.slane %v4595_v60, %v550_v58 }
  0xee   :  { %v567_v2 = vrot.slane %v551_v63, %v550_v58  ;;  %v559_v3 = vcombine.high %v551_v63, %v551_v63  ;;  %v558_v4 = vrot.slane %v544_v61, %v550_v58 }
  0xf0   :  { %v598_v5 = vrot.slane %v567_v2, %v597_v1  ;;  %v589_v6 = vcombine.high %v567_v2, %v567_v2  ;;  %v581_v7 = vrot.slane %v559_v3, %v550_v58  ;;  %v574_v8 = vrot.slane %v558_v4, %v550_v58 }
  0xf1   :  { %v560_v9 = vcombine.high %v558_v4, %v558_v4 }
  0xf2   :  { %v635_v10 = vsel %vm542_vm2, %v598_v5, -inf  ;;  %v606_v11 = vrot.slane %v589_v6, %v597_v1  ;;  %v602_v12 = vrot.slane %v581_v7, %v597_v1  ;;  %v591_v13 = vcombine.high %v581_v7, %v581_v7 }
  0xf3   :  { %v644_v14 = vsel %vm643_vm3, %v635_v10, -inf  ;;  %v614_v15 = vrot.slane %v574_v8, %v597_v1  ;;  %v588_v16 = vrot.slane %v560_v9, %v550_v58  ;;  %v590_v20 = vcombine.high %v574_v8, %v574_v8  ;;  %v1185_v10 = vld [vmem:[%s5367_s5 + $0x28] sm:$0xf] }
  0xf4   :  { %645 = vmax.xlane.f32.xlu0 %v644_v14  ;;  %v637_v17 = vsel %vm542_vm2, %v606_v11, -inf  ;;  %v636_v18 = vsel %vm542_vm2, %v602_v12, -inf  ;;  %v610_v19 = vrot.slane %v591_v13, %v597_v1  ;;  %v1192_v11 = vsel %vm1190_vm13, %v1185_v10, 0  ;;  %v1184_v13 = vld [vmem:[%s5367_s5 + $0x20] sm:$0xff] }
  0xf5   :  { %v650_v21 = vsel %vm643_vm3, %v637_v17, -inf  ;;  %v618_v23 = vrot.slane %v588_v16, %v597_v1  ;;  %v592_v24 = vcombine.high %v588_v16, %v588_v16  ;;  %v647_v25 = vsel %vm643_vm3, %v636_v18, -inf  ;;  %v1183_v16 = vld [vmem:[%s5367_s5 + $0x18] sm:$0xff]  ;;  %v1182_v17 = vld [vmem:[%s5367_s5 + $0x10] sm:$0xff]  ;;  %v1181_v18 = vld [vmem:[%s5367_s5 + $0x8] sm:$0xff] }
  0xf6   :  { %651 = vmax.xlane.f32.xlu1 %v650_v21  ;;  %v638_v22 = vsel %vm542_vm2, %v610_v19, -inf  ;;  %v639_v26 = vsel %vm542_vm2, %v614_v15, -inf  ;;  %v622_v27 = vrot.slane %v590_v20, %v597_v1  ;;  %v4668_v12 = vand.u32 4294901760, %v1192_v11 }
  0xf7   :  { %v653_v28 = vsel %vm643_vm3, %v638_v22, -inf  ;;  %v640_v29 = vsel %vm542_vm2, %v618_v23, -inf  ;;  %v626_v30 = vrot.slane %v592_v24, %v597_v1  ;;  %v656_v31 = vsel %vm643_vm3, %v639_v26, -inf  ;;  %v1180_v23 = vld [vmem:[%s5367_s5] sm:$0xff] }
  0xf8   :  { %648 = vmax.xlane.f32.xlu0 %v647_v25  ;;  %v641_v32 = vsel %vm542_vm2, %v622_v27, -inf  ;;  %v659_v33 = vsel %vm643_vm3, %v640_v29, -inf  ;;  %v4674_v14 = vsub.f32 %v1192_v11, %v4668_v12  ;;  %v4676_v15 = vand.u32 4294901760, %v1184_v13 }
  0xf9   :  { %v642_v34 = vsel %vm542_vm2, %v626_v30, -inf  ;;  %v662_v36 = vsel %vm643_vm3, %v641_v32, -inf  ;;  %v4693_v21 = vand.u32 4294901760, %v1183_v16  ;;  %v4695_v22 = vand.u32 4294901760, %v1182_v17 }
  0xfa   :  { %654 = vmax.xlane.f32.xlu1 %v653_v28  ;;  %v665_v37 = vsel %vm643_vm3, %v642_v34, -inf  ;;  %v1298_v19 = vand.u32 4294901760, %v4674_v14  ;;  %v4691_v20 = vsub.f32 %v1184_v13, %v4676_v15  ;;  %v4701_v24 = vand.u32 4294901760, %v1181_v18 }
  0xfb   :  { %v4703_v25 = vand.u32 4294901760, %v1180_v23  ;;  %v4711_v28 = vsub.f32 %v1183_v16, %v4693_v21  ;;  %v4714_v29 = vsub.f32 %v1182_v17, %v4695_v22 }
  0xfc   :  { %657 = vmax.xlane.f32.xlu0 %v656_v31  ;;  %v1299_v26 = vsub.f32 %v4674_v14, %v1298_v19  ;;  %v1305_v27 = vand.u32 4294901760, %v4691_v20  ;;  %v4718_v30 = vsub.f32 %v1181_v18, %v4701_v24 }
  0xfd   :  { %v4721_v31 = vsub.f32 %v1180_v23, %v4703_v25  ;;  %v1312_v34 = vand.u32 4294901760, %v4711_v28 }
  0xfe   :  { %660 = vmax.xlane.f32.xlu1 %v659_v33  ;;  %v1300_v32 = vand.u32 4294901760, %v1299_v26  ;;  %v1306_v33 = vsub.f32 %v4691_v20, %v1305_v27 }
  0xff   :  { %v1333_v38 = vand.u32 4294901760, %v4721_v31 }
 0x100   :  { %663 = vmax.xlane.f32.xlu0 %v662_v36  ;;  %v1319_v36 = vand.u32 4294901760, %v4714_v29  ;;  %v1307_v42 = vand.u32 4294901760, %v1306_v33 }
 0x102   :  { %666 = vmax.xlane.f32.xlu1 %v665_v37  ;;  %v1326_v37 = vand.u32 4294901760, %v4718_v30 }
 0x17d   :  { %v646_v44 = vpop.xlane.xlu0 %645 }
 0x17e   :  { %v681_v47 = vrot.slane %v646_v44, %v4587_v35  ;;  %v1313_v44 = vsub.f32 %v4711_v28, %v1312_v34 }
 0x17f   :  { %v652_v45 = vpop.xlane.xlu1 %651 }
 0x180   :  { %v689_v49 = vrot.slane %v652_v45, %v4587_v35  ;;  %v1320_v45 = vsub.f32 %v4714_v29, %v1319_v36 }
 0x181   :  { %v649_v46 = vpop.xlane.xlu0 %648 }
 0x182   :  { %v685_v48 = vrot.slane %v649_v46, %v4587_v35  ;;  %v1327_v46 = vsub.f32 %v4718_v30, %v1326_v37 }
 0x183   :  { %v655_v50 = vpop.xlane.xlu1 %654 }
 0x184   :  { %v711_v51 = vsel %vm710_vm5, %v685_v48, %v681_v47  ;;  %v693_v52 = vrot.slane %v655_v50, %v4587_v35  ;;  %v1314_v47 = vand.u32 4294901760, %v1313_v44  ;;  %v1321_v48 = vand.u32 4294901760, %v1320_v45  ;;  %v2160_v45 = vld [vmem:[%s5368_s6 + $0x18] sm:$0xff] }
 0x185   :  { %v713_v53 = vsel %vm712_vm6, %v689_v49, %v711_v51  ;;  %v658_v54 = vpop.xlane.xlu0 %657  ;;  %v1334_v49 = vsub.f32 %v4721_v31, %v1333_v38  ;;  %v1328_v50 = vand.u32 4294901760, %v1327_v46 }
 0x186   :  { %v715_v55 = vsel %vm714_vm7, %v693_v52, %v713_v53  ;;  %v697_v56 = vrot.slane %v658_v54, %v4587_v35 }
 0x187   :  { %v661_v57 = vpop.xlane.xlu1 %660  ;;  %v1335_v51 = vand.u32 4294901760, %v1334_v49  ;;  %v2159_v49 = vld [vmem:[%s5368_s6 + $0x10] sm:$0xff] }
 0x188   :  { %v717_v58 = vsel %vm716_vm8, %v697_v56, %v715_v55  ;;  %v701_v59 = vrot.slane %v661_v57, %v4587_v35 }
 0x189   :  { %v664_v61 = vpop.xlane.xlu0 %663 }
 0x18a   :  { %v719_v62 = vsel %vm718_vm9, %v701_v59, %v717_v58  ;;  %v705_v63 = vrot.slane %v664_v61, %v4587_v35 }
 0x18b   :  { %v667_v1 = vpop.xlane.xlu1 %666 }
 0x18c   :  { %v721_v2 = vsel %vm720_vm10, %v705_v63, %v719_v62  ;;  %v709_v3 = vrot.slane %v667_v1, %v4587_v35 }
 0x18e   :  { %v723_v4 = vsel %vm722_vm11, %v709_v3, %v721_v2 }
 0x18f   :  { %v725_v5 = vsel %vm724_vm12, %v723_v4, 0 }
 0x190   :  { %v797_v6 = vand.u32 4294901760, %v725_v5 }
 0x192   :  { %v798_v7 = vsub.f32 %v725_v5, %v797_v6  ;;  %4027 = vmatmul.mubr.f32.vlgmr.msra.gmra.mxu1 %v797_v6 }
 0x193   :  { %4035 = vmatpush3.msra.mxu1 %v4619_v39  ;;  %4036 = vmatprep.mubr.msk.f32.mxu1 %vm4447_vm1, %v4446_v0 }
 0x194   :  { %v799_v8 = vand.u32 4294901760, %v798_v7  ;;  %4044 = vmatprep.subr.mxu1 %v4446_v0 }
 0x196   :  { %4037 = vmatmul.mubr.f32.vlgmr.msra.gmra.mxu1 %v799_v8  ;;  %v800_v9 = vsub.f32 %v798_v7, %v799_v8 }
 0x197   :  { %4045 = vmatpush3.msra.mxu1 %v4619_v39  ;;  %4046 = vmatprep.mubr.msk.f32.mxu1 %vm4447_vm1, %v4446_v0 }
 0x198   :  { %v801_v35 = vand.u32 4294901760, %v800_v9  ;;  %4064 = vmatprep.subr.mxu1 %v4446_v0 }
 0x19a   :  { %4022 = vmatmul.mubr.f32.vlgmr.msra.gmra.mxu0 %v801_v35  ;;  %4047 = vmatmul.mubr.f32.vlgmr.msra.gmra.mxu1 %v797_v6 }
 0x19b   :  { %4030 = vmatpush3.msra.mxu0 %v4622_v40  ;;  %4031 = vmatprep.mubr.msk.f32.mxu0 %vm4447_vm1, %v4446_v0 }
 0x19c   :  { %4039 = vmatprep.subr.mxu0 %v4446_v0  ;;  %4076 = vmatprep.mubr.msk.f32.mxu1 %vm4447_vm1, %v4446_v0 }
 0x19d   :  { %4065 = vmatpush3.msra.mxu1 %v1300_v32 }
 0x19e   :  { %4032 = vmatmul.mubr.f32.vlgmr.msra.gmra.mxu0 %v798_v7  ;;  %4066 = vmatprep.subr.mxu1 %v4446_v0 }
 0x19f   :  { %4040 = vmatpush3.msra.mxu0 %v4627_v41  ;;  %4041 = vmatprep.mubr.msk.f32.mxu0 %vm4447_vm1, %v4446_v0 }
 0x1a0   :  { %4049 = vmatprep.subr.mxu0 %v4446_v0  ;;  %4067 = vmatpush3.msra.mxu1 %v1307_v42 }
 0x1a1   :  { %4068 = vmatprep.subr.mxu1 %v4446_v0 }
 0x1a2   :  { %4042 = vmatmul.mubr.f32.vlgmr.msra.gmra.mxu0 %v797_v6  ;;  %4069 = vmatpush3.msra.mxu1 %v1314_v47 }
 0x1a3   :  { %4061 = vmatprep.mubr.msk.f32.mxu0 %vm4447_vm1, %v4446_v0  ;;  %4050 = vmatpush3.msra.mxu0 %v4668_v12 }
 0x1a4   :  { %4051 = vmatprep.subr.mxu0 %v4446_v0  ;;  %4070 = vmatprep.subr.mxu1 %v4446_v0 }
 0x1a5   :  { %4052 = vmatpush3.msra.mxu0 %v4676_v15  ;;  %4071 = vmatpush3.msra.mxu1 %v1321_v48  ;;  %v4880_v48 = vand.u32 4294901760, %v2160_v45 }
 0x1a6   :  { %4053 = vmatprep.subr.mxu0 %v4446_v0  ;;  %4072 = vmatprep.subr.mxu1 %v4446_v0 }
 0x1a7   :  { %4054 = vmatpush3.msra.mxu0 %v4693_v21  ;;  %4073 = vmatpush3.msra.mxu1 %v1328_v50 }
 0x1a8   :  { %4055 = vmatprep.subr.mxu0 %v4446_v0  ;;  %4074 = vmatprep.subr.mxu1 %v4446_v0 }
 0x1a9   :  { %4056 = vmatpush3.msra.mxu0 %v4695_v22  ;;  %4075 = vmatpush3.msra.mxu1 %v1335_v51 }
 0x1aa   :  { %4057 = vmatprep.subr.mxu0 %v4446_v0  ;;  %4094 = vmatprep.subr.mxu1 %v4446_v0 }
 0x1ab   :  { %4058 = vmatpush3.msra.mxu0 %v4701_v24 }
 0x1ac   :  { %4059 = vmatprep.subr.mxu0 %v4446_v0 }
 0x1ad   :  { %4060 = vmatpush3.msra.mxu0 %v4703_v25 }
 0x1ae   :  { %4079 = vmatprep.subr.mxu0 %v4446_v0 }
 0x252   :  { %v879_v52 = vpop.f32.mrf.mxu1 }
 0x254   :  { %v4028_v53 = vpop.f32.mrf.mxu1 }
 0x255   :  { %v4894_v53 = vand.u32 4294901760, %v2159_v49 }
 0x256   :  { %v1027_v54 = vpop.f32.mrf.mxu1 }
 0x258   :  { %v4038_v55 = vpop.f32.mrf.mxu1 }
 0x25a   :  { %v803_v56 = vpop.f32.mrf.mxu0  ;;  %v1173_v57 = vpop.f32.mrf.mxu1 }
 0x25b   :  { %v880_v61 = vadd.f32 %v879_v52, %v803_v56  ;;  %v4892_v52 = vsub.f32 %v2160_v45, %v4880_v48 }
 0x25c   :  { %v4023_v58 = vpop.f32.mrf.mxu0  ;;  %v4048_v59 = vpop.f32.mrf.mxu1 }
 0x25d   :  { %v4906_v58 = vsub.f32 %v2159_v49, %v4894_v53  ;;  %v2689_v49 = vld [vmem:[%s5369_s8 + $0x10] sm:$0xff] }
 0x25e   :  { %v953_v62 = vpop.f32.mrf.mxu0 }
 0x25f   :  { %v954_v63 = vadd.f32 %v953_v62, %v880_v61  ;;  %v2157_v61 = vld [vmem:[%s5368_s6] sm:$0xff] }
 0x260   :  { %v4033_v1 = vpop.f32.mrf.mxu0 }
 0x261   :  { %v1028_v2 = vadd.f32 %v1027_v54, %v954_v63  ;;  %v2158_v54 = vld [vmem:[%s5368_s6 + $0x8] sm:$0xff]  ;;  %v2294_v1 = vand.u32 4294901760, %v4906_v58 }
 0x262   :  { %v1101_v3 = vpop.f32.mrf.mxu0  ;;  %v4909_v59 = vand.u32 4294901760, %v2158_v54 }
 0x263   :  { %v1102_v4 = vadd.f32 %v1101_v3, %v1028_v2  ;;  %v4919_v2 = vand.u32 4294901760, %v2157_v61 }
 0x264   :  { %v4043_v5 = vpop.f32.mrf.mxu0  ;;  %v4923_v3 = vsub.f32 %v2158_v54, %v4909_v59 }
 0x265   :  { %v1174_v6 = vadd.f32 %v1173_v57, %v1102_v4  ;;  %v2287_v57 = vand.u32 4294901760, %v4892_v52  ;;  %v2295_v5 = vsub.f32 %v4906_v58, %v2294_v1 }
 0x267   :  { %v1177_v7 = vsub.f32 %v4595_v60, %v1174_v6  ;;  %v2288_v63 = vsub.f32 %v4892_v52, %v2287_v57  ;;  %v4930_v6 = vsub.f32 %v2157_v61, %v4919_v2  ;;  %v2688_v61 = vld [vmem:[%s5369_s8 + $0x8] sm:$0xff] }
 0x269   :  { %v1178_v8 = vmul.f32 1.442695, %v1177_v7  ;;  %v2289_v4 = vand.u32 4294901760, %v2288_v63  ;;  %v2301_v7 = vand.u32 4294901760, %v4923_v3  ;;  %v2687_v63 = vld [vmem:[%s5369_s8] sm:$0xff] }
 0x26b   :  { %4442 = vpow2.f32 %v1178_v8  ;;  %v2296_v8 = vand.u32 4294901760, %v2295_v5 }
 0x278   :  { %v4756_v9 = vpop.eup %4442 }
 0x279   :  { %v1188_v35 = vsel %vm1186_vm14, %v4756_v9, 0 }
 0x27a   :  { %v4760_v10 = vand.u32 4294901760, %v1188_v35 }
 0x27c   :  { %v1266_v11 = vsub.f32 %v1188_v35, %v4760_v10  ;;  %4077 = vmatmul.mubr.f32.vlgmr.msra.gmra.mxu1 %v4760_v10  ;;  %v2308_v35 = vand.u32 4294901760, %v4930_v6 }
 0x27d   :  { %4095 = vmatpush3.msra.mxu1 %v4668_v12  ;;  %4106 = vmatprep.mubr.msk.f32.mxu1 %vm4447_vm1, %v4446_v0 }
 0x27e   :  { %4096 = vmatprep.subr.mxu1 %v4446_v0  ;;  %v1267_v60 = vand.u32 4294901760, %v1266_v11 }
 0x27f   :  { %4097 = vmatpush3.msra.mxu1 %v4676_v15 }
 0x280   :  { %4098 = vmatprep.subr.mxu1 %v4446_v0  ;;  %v1268_v13 = vsub.f32 %v1266_v11, %v1267_v60 }
 0x281   :  { %4099 = vmatpush3.msra.mxu1 %v4693_v21 }
 0x282   :  { %4100 = vmatprep.subr.mxu1 %v4446_v0  ;;  %v1269_v16 = vand.u32 4294901760, %v1268_v13 }
 0x283   :  { %4101 = vmatpush3.msra.mxu1 %v4695_v22 }
 0x284   :  { %4102 = vmatprep.subr.mxu1 %v4446_v0  ;;  %4062 = vmatmul.mubr.f32.vlgmr.msra.gmra.mxu0 %v1269_v16 }
 0x285   :  { %4080 = vmatpush3.msra.mxu0 %v4674_v14  ;;  %4103 = vmatpush3.msra.mxu1 %v4701_v24 }
 0x286   :  { %4081 = vmatprep.subr.mxu0 %v4446_v0  ;;  %4104 = vmatprep.subr.mxu1 %v4446_v0 }
 0x287   :  { %4082 = vmatpush3.msra.mxu0 %v4691_v20  ;;  %4105 = vmatpush3.msra.mxu1 %v4703_v25 }
 0x288   :  { %4083 = vmatprep.subr.mxu0 %v4446_v0  ;;  %4107 = vmatmul.mubr.f32.vlgmr.msra.gmra.mxu1 %v1267_v60 }
 0x289   :  { %4124 = vmatprep.subr.mxu1 %v4446_v0  ;;  %4084 = vmatpush3.msra.mxu0 %v4711_v28 }
 0x28a   :  { %4125 = vmatpush3.msra.mxu1 %v4668_v12  ;;  %4085 = vmatprep.subr.mxu0 %v4446_v0 }
 0x28b   :  { %4126 = vmatprep.subr.mxu1 %v4446_v0  ;;  %4086 = vmatpush3.msra.mxu0 %v4714_v29 }
 0x28c   :  { %4127 = vmatpush3.msra.mxu1 %v4676_v15  ;;  %4087 = vmatprep.subr.mxu0 %v4446_v0 }
 0x28d   :  { %4128 = vmatprep.subr.mxu1 %v4446_v0  ;;  %4088 = vmatpush3.msra.mxu0 %v4718_v30 }
 0x28e   :  { %4129 = vmatpush3.msra.mxu1 %v4693_v21  ;;  %4089 = vmatprep.subr.mxu0 %v4446_v0 }
 0x28f   :  { %4130 = vmatprep.subr.mxu1 %v4446_v0  ;;  %4090 = vmatpush3.msra.mxu0 %v4721_v31 }
 0x290   :  { %4091 = vmatprep.mubr.msk.f32.mxu0 %vm4447_vm1, %v4446_v0  ;;  %4131 = vmatpush3.msra.mxu1 %v4695_v22 }
 0x291   :  { %4092 = vmatmul.mubr.f32.vlgmr.msra.gmra.mxu0 %v1266_v11  ;;  %4109 = vmatprep.subr.mxu0 %v4446_v0  ;;  %v2309_v11 = vsub.f32 %v4930_v6, %v2308_v35 }
 0x292   :  { %4132 = vmatprep.subr.mxu1 %v4446_v0  ;;  %4110 = vmatpush3.msra.mxu0 %v1298_v19 }
 0x293   :  { %4133 = vmatpush3.msra.mxu1 %v4701_v24  ;;  %4111 = vmatprep.subr.mxu0 %v4446_v0  ;;  %v2310_v13 = vand.u32 4294901760, %v2309_v11 }
 0x294   :  { %4134 = vmatprep.subr.mxu1 %v4446_v0  ;;  %4112 = vmatpush3.msra.mxu0 %v1305_v27 }
 0x295   :  { %4135 = vmatpush3.msra.mxu1 %v4703_v25  ;;  %4136 = vmatprep.mubr.msk.f32.mxu1 %vm4447_vm1, %v4446_v0 }
 0x296   :  { %4113 = vmatprep.subr.mxu0 %v4446_v0  ;;  %4137 = vmatmul.mubr.f32.vlgmr.msra.gmra.mxu1 %v4760_v10 }
 0x297   :  { %4114 = vmatpush3.msra.mxu0 %v1312_v34  ;;  %4121 = vmatprep.mubr.msk.f32.mxu0 %vm4447_vm1, %v4446_v0 }
 0x298   :  { %4115 = vmatprep.subr.mxu0 %v4446_v0  ;;  %4144 = vmatprep.subr.mxu1 %v4446_v0 }
 0x299   :  { %4116 = vmatpush3.msra.mxu0 %v1319_v36  ;;  %4145 = vmatpush3.msra.mxu1 %v4631_v43 }
 0x29a   :  { %4117 = vmatprep.subr.mxu0 %v4446_v0  ;;  %4146 = vmatprep.mubr.msk.f32.mxu1 %vm4447_vm1, %v4446_v0 }
 0x29b   :  { %4118 = vmatpush3.msra.mxu0 %v1326_v37  ;;  %4154 = vmatprep.subr.mxu1 %v4446_v0 }
 0x29c   :  { %4119 = vmatprep.subr.mxu0 %v4446_v0 }
 0x29d   :  { %4120 = vmatpush3.msra.mxu0 %v1333_v38 }
 0x29e   :  { %4122 = vmatmul.mubr.f32.vlgmr.msra.gmra.mxu0 %v4760_v10  ;;  %4139 = vmatprep.subr.mxu0 %v4446_v0  ;;  %v2302_v10 = vsub.f32 %v4923_v3, %v2301_v7 }
 0x29f   :  { %4140 = vmatpush3.msra.mxu0 %v4619_v39  ;;  %4141 = vmatprep.mubr.msk.f32.mxu0 %vm4447_vm1, %v4446_v0 }
 0x2a0   :  { %4149 = vmatprep.subr.mxu0 %v4446_v0  ;;  %v2303_v60 = vand.u32 4294901760, %v2302_v10 }
 0x33c   :  { %v1372_v43 = vpop.f32.mrf.mxu1 }
 0x33e   :  { %v4078_v12 = vpop.f32.mrf.mxu1 }
 0x344   :  { %v1271_v14 = vpop.f32.mrf.mxu0 }
 0x345   :  { %v1373_v22 = vadd.f32 %v1372_v43, %v1271_v14 }
 0x346   :  { %v4063_v15 = vpop.f32.mrf.mxu0 }
 0x348   :  { %v1535_v17 = vpop.f32.mrf.mxu1 }
 0x34a   :  { %v4108_v18 = vpop.f32.mrf.mxu1 }
 0x351   :  { %v1456_v19 = vpop.f32.mrf.mxu0 }
 0x352   :  { %v1457_v24 = vadd.f32 %v1456_v19, %v1373_v22 }
 0x353   :  { %v4093_v20 = vpop.f32.mrf.mxu0 }
 0x354   :  { %v1536_v25 = vadd.f32 %v1535_v17, %v1457_v24 }
 0x356   :  { %v1701_v21 = vpop.f32.mrf.mxu1 }
 0x358   :  { %v4138_v23 = vpop.f32.mrf.mxu1 }
 0x35e   :  { %v1624_v26 = vpop.f32.mrf.mxu0 }
 0x35f   :  { %v1625_v27 = vadd.f32 %v1624_v26, %v1536_v25 }
 0x360   :  { %v4123_v28 = vpop.f32.mrf.mxu0 }
 0x361   :  { %v1702_v29 = vadd.f32 %v1701_v21, %v1625_v27 }
 0x363   :  { %4444 = vrcp.f32 %v1702_v29 }
 0x370   :  { %v4445_v30 = vpop.eup %4444 }
 0x371   :  { %v1708_v31 = vsel %vm724_vm12, %v4445_v30, 0 }
 0x372   :  { %v1776_v32 = vand.u32 4294901760, %v1708_v31 }
 0x374   :  { %v1777_v33 = vsub.f32 %v1708_v31, %v1776_v32  ;;  %4147 = vmatmul.mubr.f32.vlgmr.msra.gmra.mxu1 %v1776_v32 }
 0x375   :  { %4155 = vmatpush3.msra.mxu1 %v4619_v39  ;;  %4156 = vmatprep.mubr.msk.f32.mxu1 %vm4447_vm1, %v4446_v0 }
 0x376   :  { %v1778_v34 = vand.u32 4294901760, %v1777_v33  ;;  %4164 = vmatprep.subr.mxu1 %v4446_v0 }
 0x378   :  { %4157 = vmatmul.mubr.f32.vlgmr.msra.gmra.mxu1 %v1778_v34  ;;  %v1779_v36 = vsub.f32 %v1777_v33, %v1778_v34 }
 0x379   :  { %4165 = vmatpush3.msra.mxu1 %v4619_v39  ;;  %4166 = vmatprep.mubr.msk.f32.mxu1 %vm4447_vm1, %v4446_v0  ;;  %v2162_v39 = vld [vmem:[%s5368_s6 + $0x28] sm:$0xf] }
 0x37a   :  { %v1780_v37 = vand.u32 4294901760, %v1779_v36  ;;  %4184 = vmatprep.subr.mxu1 %v4446_v0 }
 0x37c   :  { %4142 = vmatmul.mubr.f32.vlgmr.msra.gmra.mxu0 %v1780_v37  ;;  %4167 = vmatmul.mubr.f32.vlgmr.msra.gmra.mxu1 %v1776_v32 }
 0x37d   :  { %4150 = vmatpush3.msra.mxu0 %v4622_v40  ;;  %4151 = vmatprep.mubr.msk.f32.mxu0 %vm4447_vm1, %v4446_v0  ;;  %v2167_v40 = vsel %vm1190_vm13, %v2162_v39, 0  ;;  %v2691_v39 = vld [vmem:[%s5369_s8 + $0x20] sm:$0xff] }
 0x37e   :  { %4159 = vmatprep.subr.mxu0 %v4446_v0  ;;  %4196 = vmatprep.mubr.msk.f32.mxu1 %vm4447_vm1, %v4446_v0  ;;  %v4861_v38 = vand.u32 4294901760, %v2167_v40  ;;  %v4993_v45 = vand.u32 4294901760, %v2691_v39 }
 0x380   :  { %4152 = vmatmul.mubr.f32.vlgmr.msra.gmra.mxu0 %v1777_v33  ;;  %v4867_v42 = vsub.f32 %v2167_v40, %v4861_v38  ;;  %v2692_v33 = vld [vmem:[%s5369_s8 + $0x28] sm:$0xf] }
 0x381   :  { %4160 = vmatpush3.msra.mxu0 %v4627_v41  ;;  %4161 = vmatprep.mubr.msk.f32.mxu0 %vm4447_vm1, %v4446_v0  ;;  %v2161_v41 = vld [vmem:[%s5368_s6 + $0x20] sm:$0xff]  ;;  %v2694_v36 = vsel %vm1190_vm13, %v2692_v33, 0 }
 0x382   :  { %4169 = vmatprep.subr.mxu0 %v4446_v0  ;;  %v4869_v44 = vand.u32 4294901760, %v2161_v41  ;;  %v2273_v46 = vand.u32 4294901760, %v4867_v42  ;;  %v4984_v40 = vand.u32 4294901760, %v2694_v36 }
 0x384   :  { %4162 = vmatmul.mubr.f32.vlgmr.msra.gmra.mxu0 %v1776_v32  ;;  %v4878_v47 = vsub.f32 %v2161_v41, %v4869_v44  ;;  %v2274_v50 = vsub.f32 %v4867_v42, %v2273_v46  ;;  %v2690_v41 = vld [vmem:[%s5369_s8 + $0x18] sm:$0xff] }
 0x385   :  { %4181 = vmatprep.mubr.msk.f32.mxu0 %vm4447_vm1, %v4446_v0  ;;  %4170 = vmatpush3.msra.mxu0 %v4861_v38  ;;  %v5005_v54 = vand.u32 4294901760, %v2690_v41 }
 0x386   :  { %4171 = vmatprep.subr.mxu0 %v4446_v0  ;;  %v2280_v51 = vand.u32 4294901760, %v4878_v47  ;;  %v2275_v55 = vand.u32 4294901760, %v2274_v50  ;;  %v5003_v50 = vsub.f32 %v2694_v36, %v4984_v40 }
 0x387   :  { %4172 = vmatpush3.msra.mxu0 %v4869_v44 }
 0x388   :  { %4173 = vmatprep.subr.mxu0 %v4446_v0  ;;  %v2281_v56 = vsub.f32 %v4878_v47, %v2280_v51  ;;  %4185 = vmatpush3.msra.mxu1 %v2275_v55  ;;  %v5012_v55 = vsub.f32 %v2691_v39, %v4993_v45 }
 0x389   :  { %4174 = vmatpush3.msra.mxu0 %v4880_v48  ;;  %4186 = vmatprep.subr.mxu1 %v4446_v0 }
 0x38a   :  { %4175 = vmatprep.subr.mxu0 %v4446_v0  ;;  %v2282_v62 = vand.u32 4294901760, %v2281_v56  ;;  %v5014_v56 = vand.u32 4294901760, %v2689_v49 }
 0x38b   :  { %4176 = vmatpush3.msra.mxu0 %v4894_v53 }
 0x38c   :  { %4177 = vmatprep.subr.mxu0 %v4446_v0  ;;  %4187 = vmatpush3.msra.mxu1 %v2282_v62  ;;  %v5025_v62 = vsub.f32 %v2690_v41, %v5005_v54  ;;  %v5038_v5 = vsub.f32 %v2689_v49, %v5014_v56 }
 0x38d   :  { %4178 = vmatpush3.msra.mxu0 %v4909_v59  ;;  %4188 = vmatprep.subr.mxu1 %v4446_v0 }
 0x38e   :  { %4179 = vmatprep.subr.mxu0 %v4446_v0  ;;  %4189 = vmatpush3.msra.mxu1 %v2289_v4  ;;  %v5032_v4 = vand.u32 4294901760, %v2688_v61  ;;  %v2814_v10 = vand.u32 4294901760, %v5025_v62 }
 0x38f   :  { %4180 = vmatpush3.msra.mxu0 %v4919_v2  ;;  %4190 = vmatprep.subr.mxu1 %v4446_v0 }
 0x390   :  { %4199 = vmatprep.subr.mxu0 %v4446_v0  ;;  %4191 = vmatpush3.msra.mxu1 %v2296_v8  ;;  %v5042_v8 = vand.u32 4294901760, %v2687_v63  ;;  %v5054_v11 = vsub.f32 %v2688_v61, %v5032_v4 }
 0x391   :  { %4192 = vmatprep.subr.mxu1 %v4446_v0 }
 0x392   :  { %4193 = vmatpush3.msra.mxu1 %v2303_v60  ;;  %v2821_v60 = vand.u32 4294901760, %v5038_v5 }
 0x393   :  { %4194 = vmatprep.subr.mxu1 %v4446_v0 }
 0x394   :  { %4195 = vmatpush3.msra.mxu1 %v2310_v13  ;;  %v5066_v13 = vsub.f32 %v2687_v63, %v5042_v8 }
 0x395   :  { %4214 = vmatprep.subr.mxu1 %v4446_v0 }
 0x434   :  { %v1858_v16 = vpop.f32.mrf.mxu1 }
 0x436   :  { %v4148_v43 = vpop.f32.mrf.mxu1 }
 0x438   :  { %v2006_v12 = vpop.f32.mrf.mxu1 }
 0x43a   :  { %v4158_v14 = vpop.f32.mrf.mxu1 }
 0x43c   :  { %v1782_v15 = vpop.f32.mrf.mxu0  ;;  %v2152_v17 = vpop.f32.mrf.mxu1 }
 0x43d   :  { %v1859_v20 = vadd.f32 %v1858_v16, %v1782_v15  ;;  %v2684_v15 = vld [vmem:[%s5370_s7 + $0x18] sm:$0xff] }
 0x43e   :  { %v4143_v18 = vpop.f32.mrf.mxu0  ;;  %v4168_v19 = vpop.f32.mrf.mxu1 }
 0x43f   :  { %v5223_v19 = vand.u32 4294901760, %v2684_v15 }
 0x440   :  { %v1932_v21 = vpop.f32.mrf.mxu0 }
 0x441   :  { %v1933_v22 = vadd.f32 %v1932_v21, %v1859_v20  ;;  %v2683_v20 = vld [vmem:[%s5370_s7 + $0x10] sm:$0xff] }
 0x442   :  { %v4153_v23 = vpop.f32.mrf.mxu0 }
 0x443   :  { %v2007_v24 = vadd.f32 %v2006_v12, %v1933_v22  ;;  %v5235_v23 = vsub.f32 %v2684_v15, %v5223_v19 }
 0x444   :  { %v2080_v25 = vpop.f32.mrf.mxu0 }
 0x445   :  { %v2081_v26 = vadd.f32 %v2080_v25, %v2007_v24  ;;  %v5237_v24 = vand.u32 4294901760, %v2683_v20  ;;  %v2682_v25 = vld [vmem:[%s5370_s7 + $0x8] sm:$0xff] }
 0x446   :  { %v4163_v27 = vpop.f32.mrf.mxu0 }
 0x447   :  { %v2153_v28 = vadd.f32 %v2152_v17, %v2081_v26 }
 0x449   :  { %v4949_v29 = vmul.f32 %v4756_v9, %v2153_v28  ;;  %v3331_v28 = vand.u32 4294901760, %v5235_v23 }
 0x44b   :  { %v2164_v30 = vsel %vm1186_vm14, %v4949_v29, 0  ;;  %v3332_v33 = vsub.f32 %v5235_v23, %v3331_v28 }
 0x44c   :  { %v4953_v31 = vand.u32 4294901760, %v2164_v30 }
 0x44d   :  { %v3333_v39 = vand.u32 4294901760, %v3332_v33 }
 0x44e   :  { %v4956_v32 = vsub.f32 %v2164_v30, %v4953_v31  ;;  %4197 = vmatmul.mubr.f32.vlgmr.msra.gmra.mxu1 %v4953_v31  ;;  %v5249_v30 = vsub.f32 %v2683_v20, %v5237_v24 }
 0x44f   :  { %4215 = vmatpush3.msra.mxu1 %v4861_v38  ;;  %4226 = vmatprep.mubr.msk.f32.mxu1 %vm4447_vm1, %v4446_v0 }
 0x450   :  { %4216 = vmatprep.subr.mxu1 %v4446_v0  ;;  %v4964_v9 = vand.u32 4294901760, %v4956_v32 }
 0x451   :  { %4217 = vmatpush3.msra.mxu1 %v4869_v44 }
 0x452   :  { %4218 = vmatprep.subr.mxu1 %v4446_v0  ;;  %v2243_v34 = vsub.f32 %v4956_v32, %v4964_v9 }
 0x453   :  { %4219 = vmatpush3.msra.mxu1 %v4880_v48 }
 0x454   :  { %4220 = vmatprep.subr.mxu1 %v4446_v0  ;;  %v4976_v37 = vand.u32 4294901760, %v2243_v34  ;;  %v3338_v34 = vand.u32 4294901760, %v5249_v30 }
 0x455   :  { %4221 = vmatpush3.msra.mxu1 %v4894_v53 }
 0x456   :  { %4222 = vmatprep.subr.mxu1 %v4446_v0  ;;  %4182 = vmatmul.mubr.f32.vlgmr.msra.gmra.mxu0 %v4976_v37 }
 0x457   :  { %4200 = vmatpush3.msra.mxu0 %v4867_v42  ;;  %4223 = vmatpush3.msra.mxu1 %v4909_v59 }
 0x458   :  { %4201 = vmatprep.subr.mxu0 %v4446_v0  ;;  %4224 = vmatprep.subr.mxu1 %v4446_v0 }
 0x459   :  { %4202 = vmatpush3.msra.mxu0 %v4878_v47  ;;  %4225 = vmatpush3.msra.mxu1 %v4919_v2  ;;  %v2822_v47 = vsub.f32 %v5038_v5, %v2821_v60 }
 0x45a   :  { %4203 = vmatprep.subr.mxu0 %v4446_v0  ;;  %4227 = vmatmul.mubr.f32.vlgmr.msra.gmra.mxu1 %v4964_v9 }
 0x45b   :  { %4244 = vmatprep.subr.mxu1 %v4446_v0  ;;  %4204 = vmatpush3.msra.mxu0 %v4892_v52  ;;  %v2823_v52 = vand.u32 4294901760, %v2822_v47 }
 0x45c   :  { %4245 = vmatpush3.msra.mxu1 %v4861_v38  ;;  %4205 = vmatprep.subr.mxu0 %v4446_v0  ;;  %v2800_v38 = vand.u32 4294901760, %v5003_v50 }
 0x45d   :  { %4246 = vmatprep.subr.mxu1 %v4446_v0  ;;  %4206 = vmatpush3.msra.mxu0 %v4906_v58 }
 0x45e   :  { %4247 = vmatpush3.msra.mxu1 %v4869_v44  ;;  %4207 = vmatprep.subr.mxu0 %v4446_v0  ;;  %v2807_v44 = vand.u32 4294901760, %v5012_v55 }
 0x45f   :  { %4248 = vmatprep.subr.mxu1 %v4446_v0  ;;  %4208 = vmatpush3.msra.mxu0 %v4923_v3  ;;  %v2686_v3 = vld [vmem:[%s5370_s7 + $0x28] sm:$0xf] }
 0x460   :  { %4249 = vmatpush3.msra.mxu1 %v4880_v48  ;;  %4209 = vmatprep.subr.mxu0 %v4446_v0  ;;  %v2801_v48 = vsub.f32 %v5003_v50, %v2800_v38 }
 0x461   :  { %4250 = vmatprep.subr.mxu1 %v4446_v0  ;;  %4210 = vmatpush3.msra.mxu0 %v4930_v6  ;;  %v3211_v6 = vsel %vm1190_vm13, %v2686_v3, 0 }
 0x462   :  { %4211 = vmatprep.mubr.msk.f32.mxu0 %vm4447_vm1, %v4446_v0  ;;  %4251 = vmatpush3.msra.mxu1 %v4894_v53  ;;  %v2808_v53 = vsub.f32 %v5012_v55, %v2807_v44  ;;  %v2802_v42 = vand.u32 4294901760, %v2801_v48 }
 0x463   :  { %4212 = vmatmul.mubr.f32.vlgmr.msra.gmra.mxu0 %v4956_v32  ;;  %4229 = vmatprep.subr.mxu0 %v4446_v0 }
 0x464   :  { %4252 = vmatprep.subr.mxu1 %v4446_v0  ;;  %4230 = vmatpush3.msra.mxu0 %v2273_v46  ;;  %v2815_v46 = vsub.f32 %v5025_v62, %v2814_v10  ;;  %v2809_v16 = vand.u32 4294901760, %v2808_v53 }
 0x465   :  { %4253 = vmatpush3.msra.mxu1 %v4909_v59  ;;  %4231 = vmatprep.subr.mxu0 %v4446_v0  ;;  %v2828_v59 = vand.u32 4294901760, %v5054_v11 }
 0x466   :  { %4254 = vmatprep.subr.mxu1 %v4446_v0  ;;  %4232 = vmatpush3.msra.mxu0 %v2280_v51  ;;  %v2835_v51 = vand.u32 4294901760, %v5066_v13 }
 0x467   :  { %4255 = vmatpush3.msra.mxu1 %v4919_v2  ;;  %4256 = vmatprep.mubr.msk.f32.mxu1 %vm4447_vm1, %v4446_v0  ;;  %v2816_v2 = vand.u32 4294901760, %v2815_v46  ;;  %v2829_v43 = vsub.f32 %v5054_v11, %v2828_v59 }
 0x468   :  { %4233 = vmatprep.subr.mxu0 %v4446_v0  ;;  %4257 = vmatmul.mubr.f32.vlgmr.msra.gmra.mxu1 %v4953_v31 }
 0x469   :  { %4274 = vmatprep.subr.mxu1 %v4446_v0  ;;  %4234 = vmatpush3.msra.mxu0 %v2287_v57  ;;  %v2836_v57 = vsub.f32 %v5066_v13, %v2835_v51  ;;  %v2830_v58 = vand.u32 4294901760, %v2829_v43 }
 0x46a   :  { %4275 = vmatpush3.msra.mxu1 %v2802_v42  ;;  %4235 = vmatprep.subr.mxu0 %v4446_v0 }
 0x46b   :  { %4276 = vmatprep.subr.mxu1 %v4446_v0  ;;  %4236 = vmatpush3.msra.mxu0 %v2294_v1  ;;  %v2837_v1 = vand.u32 4294901760, %v2836_v57 }
 0x46c   :  { %4277 = vmatpush3.msra.mxu1 %v2809_v16  ;;  %4237 = vmatprep.subr.mxu0 %v4446_v0 }
 0x46d   :  { %4278 = vmatprep.subr.mxu1 %v4446_v0  ;;  %4238 = vmatpush3.msra.mxu0 %v2301_v7  ;;  %v5204_v7 = vand.u32 4294901760, %v3211_v6 }
 0x46e   :  { %4279 = vmatpush3.msra.mxu1 %v2816_v2  ;;  %4239 = vmatprep.subr.mxu0 %v4446_v0 }
 0x46f   :  { %4280 = vmatprep.subr.mxu1 %v4446_v0  ;;  %4240 = vmatpush3.msra.mxu0 %v2308_v35  ;;  %v2685_v35 = vld [vmem:[%s5370_s7 + $0x20] sm:$0xff]  ;;  %v5210_v12 = vsub.f32 %v3211_v6, %v5204_v7 }
 0x470   :  { %4241 = vmatprep.mubr.msk.f32.mxu0 %vm4447_vm1, %v4446_v0  ;;  %4281 = vmatpush3.msra.mxu1 %v2823_v52  ;;  %v5212_v14 = vand.u32 4294901760, %v2685_v35 }
 0x471   :  { %4242 = vmatmul.mubr.f32.vlgmr.msra.gmra.mxu0 %v4953_v31  ;;  %4259 = vmatprep.subr.mxu0 %v4446_v0  ;;  %v3317_v17 = vand.u32 4294901760, %v5210_v12 }
 0x472   :  { %4282 = vmatprep.subr.mxu1 %v4446_v0  ;;  %4260 = vmatpush3.msra.mxu0 %v4984_v40  ;;  %v5221_v18 = vsub.f32 %v2685_v35, %v5212_v14 }
 0x473   :  { %4283 = vmatpush3.msra.mxu1 %v2830_v58  ;;  %4261 = vmatprep.subr.mxu0 %v4446_v0  ;;  %v3318_v21 = vsub.f32 %v5210_v12, %v3317_v17 }
 0x474   :  { %4284 = vmatprep.subr.mxu1 %v4446_v0  ;;  %4262 = vmatpush3.msra.mxu0 %v4993_v45  ;;  %v3324_v22 = vand.u32 4294901760, %v5221_v18 }
 0x475   :  { %4285 = vmatpush3.msra.mxu1 %v2837_v1  ;;  %4286 = vmatprep.mubr.msk.f32.mxu1 %vm4447_vm1, %v4446_v0  ;;  %v3319_v26 = vand.u32 4294901760, %v3318_v21 }
 0x476   :  { %4263 = vmatprep.subr.mxu0 %v4446_v0  ;;  %4287 = vmatmul.mubr.f32.vlgmr.msra.gmra.mxu1 %v4953_v31  ;;  %v3325_v27 = vsub.f32 %v5221_v18, %v3324_v22 }
 0x477   :  { %4304 = vmatprep.subr.mxu1 %v4446_v0  ;;  %4264 = vmatpush3.msra.mxu0 %v5005_v54 }
 0x478   :  { %4305 = vmatpush3.msra.mxu1 %v4984_v40  ;;  %4265 = vmatprep.subr.mxu0 %v4446_v0 }
 0x479   :  { %4306 = vmatprep.subr.mxu1 %v4446_v0  ;;  %4266 = vmatpush3.msra.mxu0 %v5014_v56 }
 0x47a   :  { %4307 = vmatpush3.msra.mxu1 %v4993_v45  ;;  %4267 = vmatprep.subr.mxu0 %v4446_v0 }
 0x47b   :  { %4308 = vmatprep.subr.mxu1 %v4446_v0  ;;  %4268 = vmatpush3.msra.mxu0 %v5032_v4 }
 0x47c   :  { %4309 = vmatpush3.msra.mxu1 %v5005_v54  ;;  %4269 = vmatprep.subr.mxu0 %v4446_v0 }
 0x47d   :  { %4310 = vmatprep.subr.mxu1 %v4446_v0  ;;  %4270 = vmatpush3.msra.mxu0 %v5042_v8 }
 0x47e   :  { %4271 = vmatprep.mubr.msk.f32.mxu0 %vm4447_vm1, %v4446_v0  ;;  %4311 = vmatpush3.msra.mxu1 %v5014_v56 }
 0x47f   :  { %4272 = vmatmul.mubr.f32.vlgmr.msra.gmra.mxu0 %v4976_v37  ;;  %4289 = vmatprep.subr.mxu0 %v4446_v0 }
 0x480   :  { %4312 = vmatprep.subr.mxu1 %v4446_v0  ;;  %4290 = vmatpush3.msra.mxu0 %v5003_v50 }
 0x481   :  { %4313 = vmatpush3.msra.mxu1 %v5032_v4  ;;  %4291 = vmatprep.subr.mxu0 %v4446_v0 }
 0x482   :  { %4314 = vmatprep.subr.mxu1 %v4446_v0  ;;  %4292 = vmatpush3.msra.mxu0 %v5012_v55 }
 0x483   :  { %4315 = vmatpush3.msra.mxu1 %v5042_v8  ;;  %4316 = vmatprep.mubr.msk.f32.mxu1 %vm4447_vm1, %v4446_v0 }
 0x484   :  { %4293 = vmatprep.subr.mxu0 %v4446_v0  ;;  %4317 = vmatmul.mubr.f32.vlgmr.msra.gmra.mxu1 %v4964_v9  ;;  %v3326_v9 = vand.u32 4294901760, %v3325_v27 }
 0x485   :  { %4334 = vmatprep.subr.mxu1 %v4446_v0  ;;  %4294 = vmatpush3.msra.mxu0 %v5025_v62 }
 0x486   :  { %4335 = vmatpush3.msra.mxu1 %v4984_v40  ;;  %4295 = vmatprep.subr.mxu0 %v4446_v0  ;;  %v3339_v40 = vsub.f32 %v5249_v30, %v3338_v34 }
 0x487   :  { %4336 = vmatprep.subr.mxu1 %v4446_v0  ;;  %4296 = vmatpush3.msra.mxu0 %v5038_v5 }
 0x488   :  { %4337 = vmatpush3.msra.mxu1 %v4993_v45  ;;  %4297 = vmatprep.subr.mxu0 %v4446_v0  ;;  %v3340_v49 = vand.u32 4294901760, %v3339_v40 }
 0x489   :  { %4338 = vmatprep.subr.mxu1 %v4446_v0  ;;  %4298 = vmatpush3.msra.mxu0 %v5054_v11 }
 0x48a   :  { %4339 = vmatpush3.msra.mxu1 %v5005_v54  ;;  %4299 = vmatprep.subr.mxu0 %v4446_v0 }
 0x48b   :  { %4340 = vmatprep.subr.mxu1 %v4446_v0  ;;  %4300 = vmatpush3.msra.mxu0 %v5066_v13 }
 0x48c   :  { %4301 = vmatprep.mubr.msk.f32.mxu0 %vm4447_vm1, %v4446_v0  ;;  %4341 = vmatpush3.msra.mxu1 %v5014_v56 }
 0x48d   :  { %4302 = vmatmul.mubr.f32.vlgmr.msra.gmra.mxu0 %v4956_v32  ;;  %4319 = vmatprep.subr.mxu0 %v4446_v0  ;;  %v2681_v32 = vld [vmem:[%s5370_s7] sm:$0xff] }
 0x48e   :  { %4342 = vmatprep.subr.mxu1 %v4446_v0  ;;  %4320 = vmatpush3.msra.mxu0 %v2800_v38  ;;  %v5262_v36 = vand.u32 4294901760, %v2681_v32 }
 0x48f   :  { %4343 = vmatpush3.msra.mxu1 %v5032_v4  ;;  %4321 = vmatprep.subr.mxu0 %v4446_v0 }
 0x490   :  { %4344 = vmatprep.subr.mxu1 %v4446_v0  ;;  %4322 = vmatpush3.msra.mxu0 %v2807_v44  ;;  %v5273_v41 = vsub.f32 %v2681_v32, %v5262_v36 }
 0x491   :  { %4345 = vmatpush3.msra.mxu1 %v5042_v8  ;;  %4346 = vmatprep.mubr.msk.f32.mxu1 %vm4447_vm1, %v4446_v0 }
 0x492   :  { %4323 = vmatprep.subr.mxu0 %v4446_v0  ;;  %4347 = vmatmul.mubr.f32.vlgmr.msra.gmra.mxu1 %v4953_v31  ;;  %v3352_v50 = vand.u32 4294901760, %v5273_v41 }
 0x493   :  { %4324 = vmatpush3.msra.mxu0 %v2814_v10  ;;  %4331 = vmatprep.mubr.msk.f32.mxu0 %vm4447_vm1, %v4446_v0 }
 0x494   :  { %4325 = vmatprep.subr.mxu0 %v4446_v0  ;;  %4364 = vmatprep.subr.mxu1 %v4446_v0  ;;  %v3353_v55 = vsub.f32 %v5273_v41, %v3352_v50 }
 0x495   :  { %4326 = vmatpush3.msra.mxu0 %v2821_v60  ;;  %4376 = vmatprep.mubr.msk.f32.mxu1 %vm4447_vm1, %v4446_v0 }
 0x496   :  { %4327 = vmatprep.subr.mxu0 %v4446_v0  ;;  %4365 = vmatpush3.msra.mxu1 %v3319_v26  ;;  %v3354_v61 = vand.u32 4294901760, %v3353_v55 }
 0x497   :  { %4328 = vmatpush3.msra.mxu0 %v2828_v59  ;;  %4366 = vmatprep.subr.mxu1 %v4446_v0 }
 0x498   :  { %4329 = vmatprep.subr.mxu0 %v4446_v0  ;;  %4367 = vmatpush3.msra.mxu1 %v3326_v9 }
 0x499   :  { %4330 = vmatpush3.msra.mxu0 %v2835_v51  ;;  %4368 = vmatprep.subr.mxu1 %v4446_v0 }
 0x49a   :  { %4332 = vmatmul.mubr.f32.vlgmr.msra.gmra.mxu0 %v4953_v31  ;;  %4349 = vmatprep.subr.mxu0 %v4446_v0  ;;  %v5252_v31 = vand.u32 4294901760, %v2682_v25 }
 0x49b   :  { %4361 = vmatprep.mubr.msk.f32.mxu0 %vm4447_vm1, %v4446_v0  ;;  %4350 = vmatpush3.msra.mxu0 %v5204_v7 }
 0x49c   :  { %4351 = vmatprep.subr.mxu0 %v4446_v0  ;;  %v5266_v37 = vsub.f32 %v2682_v25, %v5252_v31  ;;  %4369 = vmatpush3.msra.mxu1 %v3333_v39 }
 0x49d   :  { %4352 = vmatpush3.msra.mxu0 %v5212_v14  ;;  %4370 = vmatprep.subr.mxu1 %v4446_v0 }
 0x49e   :  { %4353 = vmatprep.subr.mxu0 %v4446_v0  ;;  %v3345_v45 = vand.u32 4294901760, %v5266_v37  ;;  %4371 = vmatpush3.msra.mxu1 %v3340_v49 }
 0x49f   :  { %4354 = vmatpush3.msra.mxu0 %v5223_v19  ;;  %4372 = vmatprep.subr.mxu1 %v4446_v0 }
 0x4a0   :  { %4355 = vmatprep.subr.mxu0 %v4446_v0  ;;  %v3346_v54 = vsub.f32 %v5266_v37, %v3345_v45 }
 0x4a1   :  { %4356 = vmatpush3.msra.mxu0 %v5237_v24 }
 0x4a2   :  { %4357 = vmatprep.subr.mxu0 %v4446_v0  ;;  %v3347_v56 = vand.u32 4294901760, %v3346_v54 }
 0x4a3   :  { %4358 = vmatpush3.msra.mxu0 %v5252_v31 }
 0x4a4   :  { %4359 = vmatprep.subr.mxu0 %v4446_v0  ;;  %4373 = vmatpush3.msra.mxu1 %v3347_v56 }
 0x4a5   :  { %4360 = vmatpush3.msra.mxu0 %v5262_v36  ;;  %4374 = vmatprep.subr.mxu1 %v4446_v0 }
 0x4a6   :  { %4379 = vmatprep.subr.mxu0 %v4446_v0  ;;  %4375 = vmatpush3.msra.mxu1 %v3354_v61 }
 0x4a7   :  { %4394 = vmatprep.subr.mxu1 %v4446_v0 }
 0x50e   :  { %v2347_v38 = vpop.f32.mrf.mxu1 }
 0x510   :  { %v4198_v62 = vpop.f32.mrf.mxu1 }
 0x516   :  { %v2246_v63 = vpop.f32.mrf.mxu0 }
 0x517   :  { %v2348_v11 = vadd.f32 %v2347_v38, %v2246_v63 }
 0x518   :  { %v4183_v4 = vpop.f32.mrf.mxu0 }
 0x51a   :  { %v2510_v44 = vpop.f32.mrf.mxu1 }
 0x51c   :  { %v4228_v5 = vpop.f32.mrf.mxu1 }
 0x523   :  { %v2431_v8 = vpop.f32.mrf.mxu0 }
 0x524   :  { %v2432_v60 = vadd.f32 %v2431_v8, %v2348_v11 }
 0x525   :  { %v4213_v48 = vpop.f32.mrf.mxu0 }
 0x526   :  { %v2511_v13 = vadd.f32 %v2510_v44, %v2432_v60 }
 0x528   :  { %v2676_v10 = vpop.f32.mrf.mxu1 }
 0x52a   :  { %v4258_v53 = vpop.f32.mrf.mxu1 }
 0x531   :  { %v2599_v42 = vpop.f32.mrf.mxu0 }
 0x532   :  { %v2600_v46 = vadd.f32 %v2599_v42, %v2511_v13 }
 0x533   :  { %v4243_v59 = vpop.f32.mrf.mxu0 }
 0x534   :  { %v2677_v16 = vadd.f32 %v2676_v10, %v2600_v46 }
 0x536   :  { %v2680_v47 = vmul.f32 %v2677_v16, %v4949_v29  ;;  %v2874_v51 = vpop.f32.mrf.mxu1 }
 0x538   :  { %v3208_v2 = vsel %vm1186_vm14, %v2680_v47, 0  ;;  %v4288_v43 = vpop.f32.mrf.mxu1 }
 0x539   :  { %v5293_v52 = vand.u32 4294901760, %v3208_v2 }
 0x53b   :  { %v3285_v57 = vsub.f32 %v3208_v2, %v5293_v52  ;;  %4377 = vmatmul.mubr.f32.vlgmr.msra.gmra.mxu1 %v5293_v52 }
 0x53c   :  { %4395 = vmatpush3.msra.mxu1 %v5204_v7  ;;  %4406 = vmatprep.mubr.msk.f32.mxu1 %vm4447_vm1, %v4446_v0 }
 0x53d   :  { %4396 = vmatprep.subr.mxu1 %v4446_v0  ;;  %v3286_v58 = vand.u32 4294901760, %v3285_v57 }
 0x53e   :  { %4397 = vmatpush3.msra.mxu1 %v5212_v14 }
 0x53f   :  { %v2773_v29 = vpop.f32.mrf.mxu0  ;;  %4398 = vmatprep.subr.mxu1 %v4446_v0  ;;  %v3287_v1 = vsub.f32 %v3285_v57, %v3286_v58 }
 0x540   :  { %v2875_v3 = vadd.f32 %v2874_v51, %v2773_v29  ;;  %4399 = vmatpush3.msra.mxu1 %v5223_v19 }
 0x541   :  { %v4273_v6 = vpop.f32.mrf.mxu0  ;;  %4400 = vmatprep.subr.mxu1 %v4446_v0  ;;  %v3288_v35 = vand.u32 4294901760, %v3287_v1 }
 0x542   :  { %4401 = vmatpush3.msra.mxu1 %v5237_v24 }
 0x543   :  { %4402 = vmatprep.subr.mxu1 %v4446_v0  ;;  %4362 = vmatmul.mubr.f32.vlgmr.msra.gmra.mxu0 %v3288_v35 }
 0x544   :  { %v3037_v15 = vpop.f32.mrf.mxu1  ;;  %4380 = vmatpush3.msra.mxu0 %v5210_v12  ;;  %4403 = vmatpush3.msra.mxu1 %v5252_v31 }
 0x545   :  { %4381 = vmatprep.subr.mxu0 %v4446_v0  ;;  %4404 = vmatprep.subr.mxu1 %v4446_v0 }
 0x546   :  { %v4318_v20 = vpop.f32.mrf.mxu1  ;;  %4382 = vmatpush3.msra.mxu0 %v5221_v18  ;;  %4405 = vmatpush3.msra.mxu1 %v5262_v36 }
 0x547   :  { %4383 = vmatprep.subr.mxu0 %v4446_v0  ;;  %4407 = vmatmul.mubr.f32.vlgmr.msra.gmra.mxu1 %v3286_v58 }
 0x548   :  { %4424 = vmatprep.subr.mxu1 %v4446_v0  ;;  %4384 = vmatpush3.msra.mxu0 %v5235_v23 }
 0x549   :  { %4425 = vmatpush3.msra.mxu1 %v5204_v7  ;;  %4385 = vmatprep.subr.mxu0 %v4446_v0 }
 0x54a   :  { %4426 = vmatprep.subr.mxu1 %v4446_v0  ;;  %4386 = vmatpush3.msra.mxu0 %v5249_v30 }
 0x54b   :  { %4427 = vmatpush3.msra.mxu1 %v5212_v14  ;;  %4387 = vmatprep.subr.mxu0 %v4446_v0 }
 0x54c   :  { %4428 = vmatprep.subr.mxu1 %v4446_v0  ;;  %4388 = vmatpush3.msra.mxu0 %v5266_v37 }
 0x54d   :  { %v2958_v21 = vpop.f32.mrf.mxu0  ;;  %4429 = vmatpush3.msra.mxu1 %v5223_v19  ;;  %4389 = vmatprep.subr.mxu0 %v4446_v0 }
 0x54e   :  { %v2959_v7 = vadd.f32 %v2958_v21, %v2875_v3  ;;  %4430 = vmatprep.subr.mxu1 %v4446_v0  ;;  %4390 = vmatpush3.msra.mxu0 %v5273_v41 }
 0x54f   :  { %v4303_v25 = vpop.f32.mrf.mxu0  ;;  %4391 = vmatprep.mubr.msk.f32.mxu0 %vm4447_vm1, %v4446_v0  ;;  %4431 = vmatpush3.msra.mxu1 %v5237_v24 }
 0x550   :  { %4392 = vmatmul.mubr.f32.vlgmr.msra.gmra.mxu0 %v3285_v57  ;;  %4409 = vmatprep.subr.mxu0 %v4446_v0  ;;  %v3038_v14 = vadd.f32 %v3037_v15, %v2959_v7 }
 0x551   :  { %4432 = vmatprep.subr.mxu1 %v4446_v0  ;;  %4410 = vmatpush3.msra.mxu0 %v3317_v17 }
 0x552   :  { %v3203_v19 = vpop.f32.mrf.mxu1  ;;  %4433 = vmatpush3.msra.mxu1 %v5252_v31  ;;  %4411 = vmatprep.subr.mxu0 %v4446_v0 }
 0x553   :  { %4434 = vmatprep.subr.mxu1 %v4446_v0  ;;  %4412 = vmatpush3.msra.mxu0 %v3324_v22 }
 0x554   :  { %v4348_v24 = vpop.f32.mrf.mxu1  ;;  %4435 = vmatpush3.msra.mxu1 %v5262_v36  ;;  %4436 = vmatprep.mubr.msk.f32.mxu1 %vm4447_vm1, %v4446_v0 }
 0x555   :  { %4413 = vmatprep.subr.mxu0 %v4446_v0  ;;  %4437 = vmatmul.mubr.f32.vlgmr.msra.gmra.mxu1 %v5293_v52 }
 0x556   :  { %4414 = vmatpush3.msra.mxu0 %v3331_v28  ;;  %4421 = vmatprep.mubr.msk.f32.mxu0 %vm4447_vm1, %v4446_v0 }
 0x557   :  { %4415 = vmatprep.subr.mxu0 %v4446_v0 }
 0x558   :  { %4416 = vmatpush3.msra.mxu0 %v3338_v34 }
 0x559   :  { %4417 = vmatprep.subr.mxu0 %v4446_v0 }
 0x55a   :  { %v3126_v12 = vpop.f32.mrf.mxu0  ;;  %4418 = vmatpush3.msra.mxu0 %v3345_v45 }
 0x55b   :  { %v3127_v17 = vadd.f32 %v3126_v12, %v3038_v14  ;;  %4419 = vmatprep.subr.mxu0 %v4446_v0 }
 0x55c   :  { %v4333_v18 = vpop.f32.mrf.mxu0  ;;  %4420 = vmatpush3.msra.mxu0 %v3352_v50 }
 0x55d   :  { %4422 = vmatmul.mubr.f32.vlgmr.msra.gmra.mxu0 %v5293_v52  ;;  %v3204_v22 = vadd.f32 %v3203_v19, %v3127_v17 }
 0x5fb   :  { %v3391_v23 = vpop.f32.mrf.mxu1 }
 0x5fd   :  { %v4378_v26 = vpop.f32.mrf.mxu1 }
 0x603   :  { %v3290_v27 = vpop.f32.mrf.mxu0 }
 0x604   :  { %v3291_v9 = vadd.f32 %v3290_v27, %v3204_v22 }
 0x605   :  { %v4363_v28 = vpop.f32.mrf.mxu0 }
 0x606   :  { %v3392_v36 = vadd.f32 %v3391_v23, %v3291_v9 }
 0x607   :  { %v3554_v30 = vpop.f32.mrf.mxu1 }
 0x609   :  { %v4408_v31 = vpop.f32.mrf.mxu1 }
 0x610   :  { %v3475_v32 = vpop.f32.mrf.mxu0 }
 0x611   :  { %v3476_v0 = vadd.f32 %v3475_v32, %v3392_v36 }
 0x612   :  { %v4393_v33 = vpop.f32.mrf.mxu0 }
 0x613   :  { %v3555_v39 = vadd.f32 %v3554_v30, %v3476_v0 }
 0x615   :  { %v3720_v34 = vpop.f32.mrf.mxu1 }
 0x617   :  { %v4438_v37 = vpop.f32.mrf.mxu1 }
 0x61d   :  { %v3643_v40 = vpop.f32.mrf.mxu0 }
 0x61e   :  { %v3644_v41 = vadd.f32 %v3643_v40, %v3555_v39 }
 0x61f   :  { %v4423_v45 = vpop.f32.mrf.mxu0 }
 0x620   :  { %v3721_v49 = vadd.f32 %v3720_v34, %v3644_v41 }
 0x622   :  { %3724 = vst [vmem:[%s5371_s9] sm:$0xff] %v3721_v49 }

</bundles_post_ra>
